<compile_context>
chip_gen: v6e
topology: v6e:2x2x1
jax: 0.10.0
libtpu: 0.0.40
codegen_flags: <defaults>
</compile_context>

<pallas_src>
import functools

import numpy as np
import jax
import jax.numpy as jnp
from jax.experimental import pallas as pl
from jax.experimental.pallas import tpu as pltpu


# ------------------------------- fused kernel -------------------------------

def _first_module_kernel(x_ref, g_ref, e_ref, m_ref, w0_ref, wbn_ref, b_ref, out_ref,
                         *, cin, cout, n_bn, wp, lp):
    """One batch element: stride-2 conv -> 3 bottlenecks -> 2x upsample -> concat."""
    x = x_ref[0]                                               # (cin, H*W) f32
    # Hoist the interior-mask broadcast once (JAX does not CSE broadcast_in_dim).
    interior = jnp.broadcast_to(m_ref[...], (cout, lp))        # (cout, lp) f32

    def shift(v, off):
        # y[:, p] = v[:, p + off] with zero fill; fill only ever lands on border /
        # pad lanes, which are zeroed by `interior` after each conv.
        if off == 0:
            return v
        c = v.shape[0]
        if off > 0:
            return jnp.concatenate([v[:, off:], jnp.zeros((c, off), v.dtype)], axis=1)
        o = -off
        return jnp.concatenate([jnp.zeros((c, o), v.dtype), v[:, :-o]], axis=1)

    # ---- Conv2d(cin->cout, 3, stride=2, pad=1) -------------------------------------
    # Polyphase split: one gather matmul, then 128-lane-aligned slices per phase.
    allph = jnp.dot(x, g_ref[...], preferred_element_type=jnp.float32)   # (cin, 4*lp)
    phases = [allph[:, p * lp:(p + 1) * lp] for p in range(4)]           # 4 x (cin, lp)

    PHASE = (1, 0, 1)   # row/col parity used by kernel offset di (or dj)
    SHIFT = (-1, 0, 0)  # row/col shift (in half-res coords) used by kernel offset

    # Stack the 9 shifted tap operands along the contracting dim -> ONE MXU matmul.
    taps0 = []
    for di in range(3):
        for dj in range(3):
            ph = PHASE[di] * 2 + PHASE[dj]
            off = SHIFT[di] * wp + SHIFT[dj]
            taps0.append(shift(phases[ph], off))
    stack0 = jnp.concatenate(taps0, axis=0)                              # (9*cin, lp)
    acc = jnp.dot(w0_ref[...], stack0, preferred_element_type=jnp.float32)
    y = (acc + b_ref[0]) * interior          # no activation after the first conv

    # ---- 3 x BottleNeck: y = y + conv2(relu(conv1(y)))  (rezero folded into conv2) --
    def conv3x3(v, conv_idx):
        taps = []
        for di in range(3):
            for dj in range(3):
                taps.append(shift(v, (di - 1) * wp + (dj - 1)))
        st = jnp.concatenate(taps, axis=0)                               # (9*cout, lp)
        a = jnp.dot(wbn_ref[conv_idx], st, preferred_element_type=jnp.float32)
        # bias add + zero the padding ring so the result is directly usable as the
        # next conv's zero-padded input.
        return (a + b_ref[conv_idx + 1]) * interior

    for k in range(n_bn):
        h = jnp.maximum(conv3x3(y, 2 * k), 0.0)
        h = conv3x3(h, 2 * k + 1)
        y = y + h

    # ---- UpsamplingNearest2d(2) + interior extraction via one expansion matmul ------
    up = jnp.dot(y, e_ref[...], preferred_element_type=jnp.float32)      # (cout, H*W)

    # ---- torch.cat((x, up), dim=1) folded into one lane-dense store ------------------
    out_ref[0] = jnp.concatenate([x, up], axis=0).astype(out_ref.dtype)


# ------------------------- structural constants (0/1) ------------------------

def _build_structure_constants(h, w):
    ho, wo = h // 2, w // 2
    hp, wp = ho + 2, wo + 2
    l = hp * wp
    lp = max(128, ((l + 127) // 128) * 128)   # lane-dense padded length
    hw = h * w

    # Fused polyphase gather: x_flat (C, H*W) @ g -> 4 padded-flat phase images (C, 4*lp).
    g = np.zeros((hw, 4 * lp), np.float32)
    for pr in range(2):
        for pc in range(2):
            ph = pr * 2 + pc
            for a in range(ho):
                for b in range(wo):
                    g[(2 * a + pr) * w + (2 * b + pc),
                      ph * lp + (a + 1) * wp + (b + 1)] = 1.0

    # Nearest-2x upsample + interior extraction: y_padflat (C, lp) @ e -> (C, H*W).
    e = np.zeros((lp, hw), np.float32)
    m = np.zeros((1, lp), np.float32)         # interior (non-padding) mask
    for i in range(ho):
        for j in range(wo):
            p = (i + 1) * wp + (j + 1)
            m[0, p] = 1.0
            for a in range(2):
                for b in range(2):
                    e[p, (2 * i + a) * w + (2 * j + b)] = 1.0
    return jnp.asarray(g), jnp.asarray(e), jnp.asarray(m), wp, lp


# ----------------------------- parameter handling ----------------------------

def _init_conv(key, cout, cin, kh, kw):
    kw_key, kb_key = jax.random.split(key)
    fan_in = cin * kh * kw
    bound = 1.0 / (fan_in ** 0.5)
    w = jax.random.uniform(kw_key, (cout, cin, kh, kw), jnp.float32, -bound, bound)
    b = jax.random.uniform(kb_key, (cout,), jnp.float32, -bound, bound)
    return w, b


def _init_bottleneck(key, cin, cout, rezero):
    k1, k2, _ = jax.random.split(key, 3)
    p = {}
    p["w1"], p["b1"] = _init_conv(k1, cout, cin, 3, 3)
    p["w2"], p["b2"] = _init_conv(k2, cout, cout, 3, 3)
    # (1x1 shortcut only needed when cin != cout; FirstModule always uses cout->cout.)
    p["alpha"] = jnp.array([0.0 if rezero else 1.0], jnp.float32)
    return p


def init_first_module(key, in_channel, out_channel, rezero):
    keys = jax.random.split(key, 4)
    params = {}
    params["conv_w"], params["conv_b"] = _init_conv(keys[0], out_channel, in_channel, 3, 3)
    params["bottlenecks"] = [
        _init_bottleneck(keys[1], out_channel, out_channel, rezero),
        _init_bottleneck(keys[2], out_channel, out_channel, rezero),
        _init_bottleneck(keys[3], out_channel, out_channel, rezero),
    ]
    return params


def pack_first_module(params):
    """Pack conv weights tap-major along the contracting dim (one matmul per conv)."""
    w0 = params["conv_w"]                              # (cout, cin, 3, 3)
    cout, cin = int(w0.shape[0]), int(w0.shape[1])
    # (cout, cin, kh, kw) -> (cout, kh, kw, cin) -> (cout, 9*cin): matches operand stack.
    w0p = jnp.transpose(w0, (0, 2, 3, 1)).reshape(cout, 9 * cin)
    wbn, biases = [], [params["conv_b"].astype(jnp.float32)]
    for p in params["bottlenecks"]:
        a = p["alpha"][0]                              # rezero scalar folded into conv2
        wbn.append(jnp.transpose(p["w1"], (0, 2, 3, 1)).reshape(cout, 9 * cout))
        wbn.append(jnp.transpose(p["w2"] * a, (0, 2, 3, 1)).reshape(cout, 9 * cout))
        biases += [p["b1"].astype(jnp.float32), (p["b2"] * a).astype(jnp.float32)]
    return {
        "w0": w0p.astype(jnp.float32),                                 # (cout, 9*cin)
        "wbn": jnp.stack(wbn, axis=0).astype(jnp.float32),             # (6, cout, 9*cout)
        "biases": jnp.stack(biases, axis=0)[:, :, None],               # (7, cout, 1)
    }


# -------------------------------- forward pass --------------------------------

def first_module_forward(x_nchw, packed):
    n, cin, h, w = x_nchw.shape
    cout = packed["w0"].shape[0]
    n_bn = (packed["biases"].shape[0] - 1) // 2
    assert packed["w0"].shape[1] == 9 * cin and h % 2 == 0 and w % 2 == 0

    g, e, m, wp, lp = _build_structure_constants(h, w)
    hw = h * w
    x_flat = x_nchw.reshape(n, cin, hw).astype(jnp.float32)

    kernel = functools.partial(_first_module_kernel, cin=cin, cout=cout,
                               n_bn=n_bn, wp=wp, lp=lp)
    out_flat = pl.pallas_call(
        kernel,
        out_shape=jax.ShapeDtypeStruct((n, cin + cout, hw), jnp.float32),
        grid=(n,),
        in_specs=[
            pl.BlockSpec((1, cin, hw), lambda b: (b, 0, 0)),            # x (per batch)
            pl.BlockSpec((hw, 4 * lp), lambda b: (0, 0)),               # polyphase gather
            pl.BlockSpec((lp, hw), lambda b: (0, 0)),                   # upsample expand
            pl.BlockSpec((1, lp), lambda b: (0, 0)),                    # interior mask
            pl.BlockSpec((cout, 9 * cin), lambda b: (0, 0)),            # first conv taps
            pl.BlockSpec((n_bn * 2, cout, 9 * cout), lambda b: (0, 0, 0)),  # bn conv taps
            pl.BlockSpec((1 + 2 * n_bn, cout, 1), lambda b: (0, 0, 0)),     # biases
        ],
        out_specs=pl.BlockSpec((1, cin + cout, hw), lambda b: (b, 0, 0)),
        compiler_params=pltpu.CompilerParams(
            dimension_semantics=("parallel",),   # batch across v7x TensorCores
        ),
    )(x_flat, g, e, m, packed["w0"], packed["wbn"], packed["biases"])
    return out_flat.reshape(n, cin + cout, h, w)


# ------------------------------------ main -------------------------------------

if __name__ == "__main__":
    in_channel, out_channel, rezero = 4, 8, False
    key = jax.random.PRNGKey(0)
    k_param, k_x = jax.random.split(key)

    params = init_first_module(k_param, in_channel, out_channel, rezero)
    packed = pack_first_module(params)
    x = jax.random.normal(k_x, (2, in_channel, 16, 16), jnp.float32)   # NCHW like PyTorch

    fwd = jax.jit(first_module_forward)
    out = jax.block_until_ready(fwd(x, packed))

    expected_shape = (2, in_channel + out_channel, 16, 16)
    assert out.shape == expected_shape, (out.shape, expected_shape)
    assert bool(jnp.all(jnp.isfinite(out)))
    print("KERNEL_OK")
</pallas_src>

<mosaic_0001>
module attributes {stable_mosaic.version = 11 : i64} {
  func.func @_first_module_kernel(%arg0: i32, %arg1: memref<1x4x256xf32, #tpu.memory_space<vmem>>, %arg2: memref<256x512xf32, #tpu.memory_space<vmem>>, %arg3: memref<128x256xf32, #tpu.memory_space<vmem>>, %arg4: memref<1x128xf32, #tpu.memory_space<vmem>>, %arg5: memref<8x36xf32, #tpu.memory_space<vmem>>, %arg6: memref<6x8x72xf32, #tpu.memory_space<vmem>>, %arg7: memref<7x8x1xf32, #tpu.memory_space<vmem>>, %arg8: memref<1x12x256xf32, #tpu.memory_space<vmem>>) attributes {dimension_semantics = [#tpu.dimension_semantics<parallel>], iteration_bounds = array<i64: 2>, scalar_prefetch = 0 : i64, scratch_operands = 0 : i64, tpu.core_type = #tpu.core_type<tc>, window_params = [{transform_indices = @transform_0, window_bounds = array<i64: 1, 4, 256>}, {pipeline_mode = #tpu.pipeline_mode<synchronous>, transform_indices = @transform_1, window_bounds = array<i64: 256, 512>}, {pipeline_mode = #tpu.pipeline_mode<synchronous>, transform_indices = @transform_2, window_bounds = array<i64: 128, 256>}, {pipeline_mode = #tpu.pipeline_mode<synchronous>, transform_indices = @transform_3, window_bounds = array<i64: 1, 128>}, {pipeline_mode = #tpu.pipeline_mode<synchronous>, transform_indices = @transform_4, window_bounds = array<i64: 8, 36>}, {pipeline_mode = #tpu.pipeline_mode<synchronous>, transform_indices = @transform_5, window_bounds = array<i64: 6, 8, 72>}, {pipeline_mode = #tpu.pipeline_mode<synchronous>, transform_indices = @transform_6, window_bounds = array<i64: 7, 8, 1>}, {transform_indices = @transform_7, window_bounds = array<i64: 1, 12, 256>}]} {
    %c0 = arith.constant 0 : index
    %c0_0 = arith.constant 0 : index
    %c0_1 = arith.constant 0 : index
    %0 = vector.load %arg1[%c0, %c0_0, %c0_1] : memref<1x4x256xf32, #tpu.memory_space<vmem>>, vector<1x4x256xf32>
    %1 = vector.shape_cast %0 : vector<1x4x256xf32> to vector<4x256xf32>
    %c0_2 = arith.constant 0 : index
    %c0_3 = arith.constant 0 : index
    %2 = vector.load %arg4[%c0_2, %c0_3] : memref<1x128xf32, #tpu.memory_space<vmem>>, vector<1x128xf32>
    %3 = vector.shape_cast %2 : vector<1x128xf32> to vector<1x128xf32>
    %4 = vector.broadcast %3 : vector<1x128xf32> to vector<8x128xf32>
    %c0_4 = arith.constant 0 : index
    %c0_5 = arith.constant 0 : index
    %5 = vector.load %arg2[%c0_4, %c0_5] : memref<256x512xf32, #tpu.memory_space<vmem>>, vector<256x512xf32>
    %cst = arith.constant dense<0.000000e+00> : vector<4x512xf32>
    %6 = tpu.matmul %1, %5, %cst {dimension_numbers = #tpu.dot_dimension_numbers<[1], [0], [0], [1], [0, 0, 1, 1], [], []>} : vector<4x256xf32>, vector<256x512xf32>, vector<4x512xf32> -> vector<4x512xf32>
    %7 = vector.extract_strided_slice %6 {offsets = [0, 0], sizes = [4, 128], strides = [1, 1]} : vector<4x512xf32> to vector<4x128xf32>
    %8 = vector.extract_strided_slice %6 {offsets = [0, 128], sizes = [4, 128], strides = [1, 1]} : vector<4x512xf32> to vector<4x128xf32>
    %9 = vector.extract_strided_slice %6 {offsets = [0, 256], sizes = [4, 128], strides = [1, 1]} : vector<4x512xf32> to vector<4x128xf32>
    %10 = vector.extract_strided_slice %6 {offsets = [0, 384], sizes = [4, 128], strides = [1, 1]} : vector<4x512xf32> to vector<4x128xf32>
    %cst_6 = arith.constant 0.000000e+00 : f32
    %11 = vector.broadcast %cst_6 : f32 to vector<4x11xf32>
    %12 = vector.extract_strided_slice %10 {offsets = [0, 0], sizes = [4, 117], strides = [1, 1]} : vector<4x128xf32> to vector<4x117xf32>
    %13 = tpu.concatenate %11, %12 in 1 : vector<4x11xf32>, vector<4x117xf32> -> vector<4x128xf32>
    %cst_7 = arith.constant 0.000000e+00 : f32
    %14 = vector.broadcast %cst_7 : f32 to vector<4x10xf32>
    %15 = vector.extract_strided_slice %9 {offsets = [0, 0], sizes = [4, 118], strides = [1, 1]} : vector<4x128xf32> to vector<4x118xf32>
    %16 = tpu.concatenate %14, %15 in 1 : vector<4x10xf32>, vector<4x118xf32> -> vector<4x128xf32>
    %cst_8 = arith.constant 0.000000e+00 : f32
    %17 = vector.broadcast %cst_8 : f32 to vector<4x10xf32>
    %18 = vector.extract_strided_slice %10 {offsets = [0, 0], sizes = [4, 118], strides = [1, 1]} : vector<4x128xf32> to vector<4x118xf32>
    %19 = tpu.concatenate %17, %18 in 1 : vector<4x10xf32>, vector<4x118xf32> -> vector<4x128xf32>
    %cst_9 = arith.constant 0.000000e+00 : f32
    %20 = vector.broadcast %cst_9 : f32 to vector<4x1xf32>
    %21 = vector.extract_strided_slice %8 {offsets = [0, 0], sizes = [4, 127], strides = [1, 1]} : vector<4x128xf32> to vector<4x127xf32>
    %22 = tpu.concatenate %20, %21 in 1 : vector<4x1xf32>, vector<4x127xf32> -> vector<4x128xf32>
    %cst_10 = arith.constant 0.000000e+00 : f32
    %23 = vector.broadcast %cst_10 : f32 to vector<4x1xf32>
    %24 = vector.extract_strided_slice %10 {offsets = [0, 0], sizes = [4, 127], strides = [1, 1]} : vector<4x128xf32> to vector<4x127xf32>
    %25 = tpu.concatenate %23, %24 in 1 : vector<4x1xf32>, vector<4x127xf32> -> vector<4x128xf32>
    %26 = tpu.concatenate %13, %16, %19, %22, %7, %8, %25, %9, %10 in 0 : vector<4x128xf32>, vector<4x128xf32>, vector<4x128xf32>, vector<4x128xf32>, vector<4x128xf32>, vector<4x128xf32>, vector<4x128xf32>, vector<4x128xf32>, vector<4x128xf32> -> vector<36x128xf32>
    %c0_11 = arith.constant 0 : index
    %c0_12 = arith.constant 0 : index
    %27 = vector.load %arg5[%c0_11, %c0_12] : memref<8x36xf32, #tpu.memory_space<vmem>>, vector<8x36xf32>
    %cst_13 = arith.constant dense<0.000000e+00> : vector<8x128xf32>
    %28 = tpu.matmul %27, %26, %cst_13 {dimension_numbers = #tpu.dot_dimension_numbers<[1], [0], [0], [1], [0, 0, 1, 1], [], []>} : vector<8x36xf32>, vector<36x128xf32>, vector<8x128xf32> -> vector<8x128xf32>
    %c0_14 = arith.constant 0 : index
    %c0_15 = arith.constant 0 : index
    %c0_16 = arith.constant 0 : index
    %29 = vector.load %arg7[%c0_14, %c0_15, %c0_16] : memref<7x8x1xf32, #tpu.memory_space<vmem>>, vector<1x8x1xf32>
    %30 = vector.shape_cast %29 : vector<1x8x1xf32> to vector<8x1xf32>
    %31 = vector.broadcast %30 : vector<8x1xf32> to vector<8x128xf32>
    %32 = arith.addf %28, %31 : vector<8x128xf32>
    %33 = arith.mulf %32, %4 : vector<8x128xf32>
    %cst_17 = arith.constant 0.000000e+00 : f32
    %34 = vector.broadcast %cst_17 : f32 to vector<8x11xf32>
    %35 = vector.extract_strided_slice %33 {offsets = [0, 0], sizes = [8, 117], strides = [1, 1]} : vector<8x128xf32> to vector<8x117xf32>
    %36 = tpu.concatenate %34, %35 in 1 : vector<8x11xf32>, vector<8x117xf32> -> vector<8x128xf32>
    %cst_18 = arith.constant 0.000000e+00 : f32
    %37 = vector.broadcast %cst_18 : f32 to vector<8x10xf32>
    %38 = vector.extract_strided_slice %33 {offsets = [0, 0], sizes = [8, 118], strides = [1, 1]} : vector<8x128xf32> to vector<8x118xf32>
    %39 = tpu.concatenate %37, %38 in 1 : vector<8x10xf32>, vector<8x118xf32> -> vector<8x128xf32>
    %cst_19 = arith.constant 0.000000e+00 : f32
    %40 = vector.broadcast %cst_19 : f32 to vector<8x9xf32>
    %41 = vector.extract_strided_slice %33 {offsets = [0, 0], sizes = [8, 119], strides = [1, 1]} : vector<8x128xf32> to vector<8x119xf32>
    %42 = tpu.concatenate %40, %41 in 1 : vector<8x9xf32>, vector<8x119xf32> -> vector<8x128xf32>
    %cst_20 = arith.constant 0.000000e+00 : f32
    %43 = vector.broadcast %cst_20 : f32 to vector<8x1xf32>
    %44 = vector.extract_strided_slice %33 {offsets = [0, 0], sizes = [8, 127], strides = [1, 1]} : vector<8x128xf32> to vector<8x127xf32>
    %45 = tpu.concatenate %43, %44 in 1 : vector<8x1xf32>, vector<8x127xf32> -> vector<8x128xf32>
    %46 = vector.extract_strided_slice %33 {offsets = [0, 1], sizes = [8, 127], strides = [1, 1]} : vector<8x128xf32> to vector<8x127xf32>
    %cst_21 = arith.constant 0.000000e+00 : f32
    %47 = vector.broadcast %cst_21 : f32 to vector<8x1xf32>
    %48 = tpu.concatenate %46, %47 in 1 : vector<8x127xf32>, vector<8x1xf32> -> vector<8x128xf32>
    %49 = vector.extract_strided_slice %33 {offsets = [0, 9], sizes = [8, 119], strides = [1, 1]} : vector<8x128xf32> to vector<8x119xf32>
    %cst_22 = arith.constant 0.000000e+00 : f32
    %50 = vector.broadcast %cst_22 : f32 to vector<8x9xf32>
    %51 = tpu.concatenate %49, %50 in 1 : vector<8x119xf32>, vector<8x9xf32> -> vector<8x128xf32>
    %52 = vector.extract_strided_slice %33 {offsets = [0, 10], sizes = [8, 118], strides = [1, 1]} : vector<8x128xf32> to vector<8x118xf32>
    %cst_23 = arith.constant 0.000000e+00 : f32
    %53 = vector.broadcast %cst_23 : f32 to vector<8x10xf32>
    %54 = tpu.concatenate %52, %53 in 1 : vector<8x118xf32>, vector<8x10xf32> -> vector<8x128xf32>
    %55 = vector.extract_strided_slice %33 {offsets = [0, 11], sizes = [8, 117], strides = [1, 1]} : vector<8x128xf32> to vector<8x117xf32>
    %cst_24 = arith.constant 0.000000e+00 : f32
    %56 = vector.broadcast %cst_24 : f32 to vector<8x11xf32>
    %57 = tpu.concatenate %55, %56 in 1 : vector<8x117xf32>, vector<8x11xf32> -> vector<8x128xf32>
    %58 = tpu.concatenate %36, %39, %42, %45, %33, %48, %51, %54, %57 in 0 : vector<8x128xf32>, vector<8x128xf32>, vector<8x128xf32>, vector<8x128xf32>, vector<8x128xf32>, vector<8x128xf32>, vector<8x128xf32>, vector<8x128xf32>, vector<8x128xf32> -> vector<72x128xf32>
    %c0_25 = arith.constant 0 : index
    %c0_26 = arith.constant 0 : index
    %c0_27 = arith.constant 0 : index
    %59 = vector.load %arg6[%c0_25, %c0_26, %c0_27] : memref<6x8x72xf32, #tpu.memory_space<vmem>>, vector<1x8x72xf32>
    %60 = vector.shape_cast %59 : vector<1x8x72xf32> to vector<8x72xf32>
    %cst_28 = arith.constant dense<0.000000e+00> : vector<8x128xf32>
    %61 = tpu.matmul %60, %58, %cst_28 {dimension_numbers = #tpu.dot_dimension_numbers<[1], [0], [0], [1], [0, 0, 1, 1], [], []>} : vector<8x72xf32>, vector<72x128xf32>, vector<8x128xf32> -> vector<8x128xf32>
    %c1 = arith.constant 1 : index
    %c0_29 = arith.constant 0 : index
    %c0_30 = arith.constant 0 : index
    %62 = vector.load %arg7[%c1, %c0_29, %c0_30] : memref<7x8x1xf32, #tpu.memory_space<vmem>>, vector<1x8x1xf32>
    %63 = vector.shape_cast %62 : vector<1x8x1xf32> to vector<8x1xf32>
    %64 = vector.broadcast %63 : vector<8x1xf32> to vector<8x128xf32>
    %65 = arith.addf %61, %64 : vector<8x128xf32>
    %66 = arith.mulf %65, %4 : vector<8x128xf32>
    %cst_31 = arith.constant 0.000000e+00 : f32
    %67 = vector.broadcast %cst_31 : f32 to vector<8x128xf32>
    %68 = arith.maximumf %66, %67 : vector<8x128xf32>
    %cst_32 = arith.constant 0.000000e+00 : f32
    %69 = vector.broadcast %cst_32 : f32 to vector<8x11xf32>
    %70 = vector.extract_strided_slice %68 {offsets = [0, 0], sizes = [8, 117], strides = [1, 1]} : vector<8x128xf32> to vector<8x117xf32>
    %71 = tpu.concatenate %69, %70 in 1 : vector<8x11xf32>, vector<8x117xf32> -> vector<8x128xf32>
    %cst_33 = arith.constant 0.000000e+00 : f32
    %72 = vector.broadcast %cst_33 : f32 to vector<8x10xf32>
    %73 = vector.extract_strided_slice %68 {offsets = [0, 0], sizes = [8, 118], strides = [1, 1]} : vector<8x128xf32> to vector<8x118xf32>
    %74 = tpu.concatenate %72, %73 in 1 : vector<8x10xf32>, vector<8x118xf32> -> vector<8x128xf32>
    %cst_34 = arith.constant 0.000000e+00 : f32
    %75 = vector.broadcast %cst_34 : f32 to vector<8x9xf32>
    %76 = vector.extract_strided_slice %68 {offsets = [0, 0], sizes = [8, 119], strides = [1, 1]} : vector<8x128xf32> to vector<8x119xf32>
    %77 = tpu.concatenate %75, %76 in 1 : vector<8x9xf32>, vector<8x119xf32> -> vector<8x128xf32>
    %cst_35 = arith.constant 0.000000e+00 : f32
    %78 = vector.broadcast %cst_35 : f32 to vector<8x1xf32>
    %79 = vector.extract_strided_slice %68 {offsets = [0, 0], sizes = [8, 127], strides = [1, 1]} : vector<8x128xf32> to vector<8x127xf32>
    %80 = tpu.concatenate %78, %79 in 1 : vector<8x1xf32>, vector<8x127xf32> -> vector<8x128xf32>
    %81 = vector.extract_strided_slice %68 {offsets = [0, 1], sizes = [8, 127], strides = [1, 1]} : vector<8x128xf32> to vector<8x127xf32>
    %cst_36 = arith.constant 0.000000e+00 : f32
    %82 = vector.broadcast %cst_36 : f32 to vector<8x1xf32>
    %83 = tpu.concatenate %81, %82 in 1 : vector<8x127xf32>, vector<8x1xf32> -> vector<8x128xf32>
    %84 = vector.extract_strided_slice %68 {offsets = [0, 9], sizes = [8, 119], strides = [1, 1]} : vector<8x128xf32> to vector<8x119xf32>
    %cst_37 = arith.constant 0.000000e+00 : f32
    %85 = vector.broadcast %cst_37 : f32 to vector<8x9xf32>
    %86 = tpu.concatenate %84, %85 in 1 : vector<8x119xf32>, vector<8x9xf32> -> vector<8x128xf32>
    %87 = vector.extract_strided_slice %68 {offsets = [0, 10], sizes = [8, 118], strides = [1, 1]} : vector<8x128xf32> to vector<8x118xf32>
    %cst_38 = arith.constant 0.000000e+00 : f32
    %88 = vector.broadcast %cst_38 : f32 to vector<8x10xf32>
    %89 = tpu.concatenate %87, %88 in 1 : vector<8x118xf32>, vector<8x10xf32> -> vector<8x128xf32>
    %90 = vector.extract_strided_slice %68 {offsets = [0, 11], sizes = [8, 117], strides = [1, 1]} : vector<8x128xf32> to vector<8x117xf32>
    %cst_39 = arith.constant 0.000000e+00 : f32
    %91 = vector.broadcast %cst_39 : f32 to vector<8x11xf32>
    %92 = tpu.concatenate %90, %91 in 1 : vector<8x117xf32>, vector<8x11xf32> -> vector<8x128xf32>
    %93 = tpu.concatenate %71, %74, %77, %80, %68, %83, %86, %89, %92 in 0 : vector<8x128xf32>, vector<8x128xf32>, vector<8x128xf32>, vector<8x128xf32>, vector<8x128xf32>, vector<8x128xf32>, vector<8x128xf32>, vector<8x128xf32>, vector<8x128xf32> -> vector<72x128xf32>
    %c1_40 = arith.constant 1 : index
    %c0_41 = arith.constant 0 : index
    %c0_42 = arith.constant 0 : index
    %94 = vector.load %arg6[%c1_40, %c0_41, %c0_42] : memref<6x8x72xf32, #tpu.memory_space<vmem>>, vector<1x8x72xf32>
    %95 = vector.shape_cast %94 : vector<1x8x72xf32> to vector<8x72xf32>
    %cst_43 = arith.constant dense<0.000000e+00> : vector<8x128xf32>
    %96 = tpu.matmul %95, %93, %cst_43 {dimension_numbers = #tpu.dot_dimension_numbers<[1], [0], [0], [1], [0, 0, 1, 1], [], []>} : vector<8x72xf32>, vector<72x128xf32>, vector<8x128xf32> -> vector<8x128xf32>
    %c2 = arith.constant 2 : index
    %c0_44 = arith.constant 0 : index
    %c0_45 = arith.constant 0 : index
    %97 = vector.load %arg7[%c2, %c0_44, %c0_45] : memref<7x8x1xf32, #tpu.memory_space<vmem>>, vector<1x8x1xf32>
    %98 = vector.shape_cast %97 : vector<1x8x1xf32> to vector<8x1xf32>
    %99 = vector.broadcast %98 : vector<8x1xf32> to vector<8x128xf32>
    %100 = arith.addf %96, %99 : vector<8x128xf32>
    %101 = arith.mulf %100, %4 : vector<8x128xf32>
    %102 = arith.addf %33, %101 : vector<8x128xf32>
    %cst_46 = arith.constant 0.000000e+00 : f32
    %103 = vector.broadcast %cst_46 : f32 to vector<8x11xf32>
    %104 = vector.extract_strided_slice %102 {offsets = [0, 0], sizes = [8, 117], strides = [1, 1]} : vector<8x128xf32> to vector<8x117xf32>
    %105 = tpu.concatenate %103, %104 in 1 : vector<8x11xf32>, vector<8x117xf32> -> vector<8x128xf32>
    %cst_47 = arith.constant 0.000000e+00 : f32
    %106 = vector.broadcast %cst_47 : f32 to vector<8x10xf32>
    %107 = vector.extract_strided_slice %102 {offsets = [0, 0], sizes = [8, 118], strides = [1, 1]} : vector<8x128xf32> to vector<8x118xf32>
    %108 = tpu.concatenate %106, %107 in 1 : vector<8x10xf32>, vector<8x118xf32> -> vector<8x128xf32>
    %cst_48 = arith.constant 0.000000e+00 : f32
    %109 = vector.broadcast %cst_48 : f32 to vector<8x9xf32>
    %110 = vector.extract_strided_slice %102 {offsets = [0, 0], sizes = [8, 119], strides = [1, 1]} : vector<8x128xf32> to vector<8x119xf32>
    %111 = tpu.concatenate %109, %110 in 1 : vector<8x9xf32>, vector<8x119xf32> -> vector<8x128xf32>
    %cst_49 = arith.constant 0.000000e+00 : f32
    %112 = vector.broadcast %cst_49 : f32 to vector<8x1xf32>
    %113 = vector.extract_strided_slice %102 {offsets = [0, 0], sizes = [8, 127], strides = [1, 1]} : vector<8x128xf32> to vector<8x127xf32>
    %114 = tpu.concatenate %112, %113 in 1 : vector<8x1xf32>, vector<8x127xf32> -> vector<8x128xf32>
    %115 = vector.extract_strided_slice %102 {offsets = [0, 1], sizes = [8, 127], strides = [1, 1]} : vector<8x128xf32> to vector<8x127xf32>
    %cst_50 = arith.constant 0.000000e+00 : f32
    %116 = vector.broadcast %cst_50 : f32 to vector<8x1xf32>
    %117 = tpu.concatenate %115, %116 in 1 : vector<8x127xf32>, vector<8x1xf32> -> vector<8x128xf32>
    %118 = vector.extract_strided_slice %102 {offsets = [0, 9], sizes = [8, 119], strides = [1, 1]} : vector<8x128xf32> to vector<8x119xf32>
    %cst_51 = arith.constant 0.000000e+00 : f32
    %119 = vector.broadcast %cst_51 : f32 to vector<8x9xf32>
    %120 = tpu.concatenate %118, %119 in 1 : vector<8x119xf32>, vector<8x9xf32> -> vector<8x128xf32>
    %121 = vector.extract_strided_slice %102 {offsets = [0, 10], sizes = [8, 118], strides = [1, 1]} : vector<8x128xf32> to vector<8x118xf32>
    %cst_52 = arith.constant 0.000000e+00 : f32
    %122 = vector.broadcast %cst_52 : f32 to vector<8x10xf32>
    %123 = tpu.concatenate %121, %122 in 1 : vector<8x118xf32>, vector<8x10xf32> -> vector<8x128xf32>
    %124 = vector.extract_strided_slice %102 {offsets = [0, 11], sizes = [8, 117], strides = [1, 1]} : vector<8x128xf32> to vector<8x117xf32>
    %cst_53 = arith.constant 0.000000e+00 : f32
    %125 = vector.broadcast %cst_53 : f32 to vector<8x11xf32>
    %126 = tpu.concatenate %124, %125 in 1 : vector<8x117xf32>, vector<8x11xf32> -> vector<8x128xf32>
    %127 = tpu.concatenate %105, %108, %111, %114, %102, %117, %120, %123, %126 in 0 : vector<8x128xf32>, vector<8x128xf32>, vector<8x128xf32>, vector<8x128xf32>, vector<8x128xf32>, vector<8x128xf32>, vector<8x128xf32>, vector<8x128xf32>, vector<8x128xf32> -> vector<72x128xf32>
    %c2_54 = arith.constant 2 : index
    %c0_55 = arith.constant 0 : index
    %c0_56 = arith.constant 0 : index
    %128 = vector.load %arg6[%c2_54, %c0_55, %c0_56] : memref<6x8x72xf32, #tpu.memory_space<vmem>>, vector<1x8x72xf32>
    %129 = vector.shape_cast %128 : vector<1x8x72xf32> to vector<8x72xf32>
    %cst_57 = arith.constant dense<0.000000e+00> : vector<8x128xf32>
    %130 = tpu.matmul %129, %127, %cst_57 {dimension_numbers = #tpu.dot_dimension_numbers<[1], [0], [0], [1], [0, 0, 1, 1], [], []>} : vector<8x72xf32>, vector<72x128xf32>, vector<8x128xf32> -> vector<8x128xf32>
    %c3 = arith.constant 3 : index
    %c0_58 = arith.constant 0 : index
    %c0_59 = arith.constant 0 : index
    %131 = vector.load %arg7[%c3, %c0_58, %c0_59] : memref<7x8x1xf32, #tpu.memory_space<vmem>>, vector<1x8x1xf32>
    %132 = vector.shape_cast %131 : vector<1x8x1xf32> to vector<8x1xf32>
    %133 = vector.broadcast %132 : vector<8x1xf32> to vector<8x128xf32>
    %134 = arith.addf %130, %133 : vector<8x128xf32>
    %135 = arith.mulf %134, %4 : vector<8x128xf32>
    %cst_60 = arith.constant 0.000000e+00 : f32
    %136 = vector.broadcast %cst_60 : f32 to vector<8x128xf32>
    %137 = arith.maximumf %135, %136 : vector<8x128xf32>
    %cst_61 = arith.constant 0.000000e+00 : f32
    %138 = vector.broadcast %cst_61 : f32 to vector<8x11xf32>
    %139 = vector.extract_strided_slice %137 {offsets = [0, 0], sizes = [8, 117], strides = [1, 1]} : vector<8x128xf32> to vector<8x117xf32>
    %140 = tpu.concatenate %138, %139 in 1 : vector<8x11xf32>, vector<8x117xf32> -> vector<8x128xf32>
    %cst_62 = arith.constant 0.000000e+00 : f32
    %141 = vector.broadcast %cst_62 : f32 to vector<8x10xf32>
    %142 = vector.extract_strided_slice %137 {offsets = [0, 0], sizes = [8, 118], strides = [1, 1]} : vector<8x128xf32> to vector<8x118xf32>
    %143 = tpu.concatenate %141, %142 in 1 : vector<8x10xf32>, vector<8x118xf32> -> vector<8x128xf32>
    %cst_63 = arith.constant 0.000000e+00 : f32
    %144 = vector.broadcast %cst_63 : f32 to vector<8x9xf32>
    %145 = vector.extract_strided_slice %137 {offsets = [0, 0], sizes = [8, 119], strides = [1, 1]} : vector<8x128xf32> to vector<8x119xf32>
    %146 = tpu.concatenate %144, %145 in 1 : vector<8x9xf32>, vector<8x119xf32> -> vector<8x128xf32>
    %cst_64 = arith.constant 0.000000e+00 : f32
    %147 = vector.broadcast %cst_64 : f32 to vector<8x1xf32>
    %148 = vector.extract_strided_slice %137 {offsets = [0, 0], sizes = [8, 127], strides = [1, 1]} : vector<8x128xf32> to vector<8x127xf32>
    %149 = tpu.concatenate %147, %148 in 1 : vector<8x1xf32>, vector<8x127xf32> -> vector<8x128xf32>
    %150 = vector.extract_strided_slice %137 {offsets = [0, 1], sizes = [8, 127], strides = [1, 1]} : vector<8x128xf32> to vector<8x127xf32>
    %cst_65 = arith.constant 0.000000e+00 : f32
    %151 = vector.broadcast %cst_65 : f32 to vector<8x1xf32>
    %152 = tpu.concatenate %150, %151 in 1 : vector<8x127xf32>, vector<8x1xf32> -> vector<8x128xf32>
    %153 = vector.extract_strided_slice %137 {offsets = [0, 9], sizes = [8, 119], strides = [1, 1]} : vector<8x128xf32> to vector<8x119xf32>
    %cst_66 = arith.constant 0.000000e+00 : f32
    %154 = vector.broadcast %cst_66 : f32 to vector<8x9xf32>
    %155 = tpu.concatenate %153, %154 in 1 : vector<8x119xf32>, vector<8x9xf32> -> vector<8x128xf32>
    %156 = vector.extract_strided_slice %137 {offsets = [0, 10], sizes = [8, 118], strides = [1, 1]} : vector<8x128xf32> to vector<8x118xf32>
    %cst_67 = arith.constant 0.000000e+00 : f32
    %157 = vector.broadcast %cst_67 : f32 to vector<8x10xf32>
    %158 = tpu.concatenate %156, %157 in 1 : vector<8x118xf32>, vector<8x10xf32> -> vector<8x128xf32>
    %159 = vector.extract_strided_slice %137 {offsets = [0, 11], sizes = [8, 117], strides = [1, 1]} : vector<8x128xf32> to vector<8x117xf32>
    %cst_68 = arith.constant 0.000000e+00 : f32
    %160 = vector.broadcast %cst_68 : f32 to vector<8x11xf32>
    %161 = tpu.concatenate %159, %160 in 1 : vector<8x117xf32>, vector<8x11xf32> -> vector<8x128xf32>
    %162 = tpu.concatenate %140, %143, %146, %149, %137, %152, %155, %158, %161 in 0 : vector<8x128xf32>, vector<8x128xf32>, vector<8x128xf32>, vector<8x128xf32>, vector<8x128xf32>, vector<8x128xf32>, vector<8x128xf32>, vector<8x128xf32>, vector<8x128xf32> -> vector<72x128xf32>
    %c3_69 = arith.constant 3 : index
    %c0_70 = arith.constant 0 : index
    %c0_71 = arith.constant 0 : index
    %163 = vector.load %arg6[%c3_69, %c0_70, %c0_71] : memref<6x8x72xf32, #tpu.memory_space<vmem>>, vector<1x8x72xf32>
    %164 = vector.shape_cast %163 : vector<1x8x72xf32> to vector<8x72xf32>
    %cst_72 = arith.constant dense<0.000000e+00> : vector<8x128xf32>
    %165 = tpu.matmul %164, %162, %cst_72 {dimension_numbers = #tpu.dot_dimension_numbers<[1], [0], [0], [1], [0, 0, 1, 1], [], []>} : vector<8x72xf32>, vector<72x128xf32>, vector<8x128xf32> -> vector<8x128xf32>
    %c4 = arith.constant 4 : index
    %c0_73 = arith.constant 0 : index
    %c0_74 = arith.constant 0 : index
    %166 = vector.load %arg7[%c4, %c0_73, %c0_74] : memref<7x8x1xf32, #tpu.memory_space<vmem>>, vector<1x8x1xf32>
    %167 = vector.shape_cast %166 : vector<1x8x1xf32> to vector<8x1xf32>
    %168 = vector.broadcast %167 : vector<8x1xf32> to vector<8x128xf32>
    %169 = arith.addf %165, %168 : vector<8x128xf32>
    %170 = arith.mulf %169, %4 : vector<8x128xf32>
    %171 = arith.addf %102, %170 : vector<8x128xf32>
    %cst_75 = arith.constant 0.000000e+00 : f32
    %172 = vector.broadcast %cst_75 : f32 to vector<8x11xf32>
    %173 = vector.extract_strided_slice %171 {offsets = [0, 0], sizes = [8, 117], strides = [1, 1]} : vector<8x128xf32> to vector<8x117xf32>
    %174 = tpu.concatenate %172, %173 in 1 : vector<8x11xf32>, vector<8x117xf32> -> vector<8x128xf32>
    %cst_76 = arith.constant 0.000000e+00 : f32
    %175 = vector.broadcast %cst_76 : f32 to vector<8x10xf32>
    %176 = vector.extract_strided_slice %171 {offsets = [0, 0], sizes = [8, 118], strides = [1, 1]} : vector<8x128xf32> to vector<8x118xf32>
    %177 = tpu.concatenate %175, %176 in 1 : vector<8x10xf32>, vector<8x118xf32> -> vector<8x128xf32>
    %cst_77 = arith.constant 0.000000e+00 : f32
    %178 = vector.broadcast %cst_77 : f32 to vector<8x9xf32>
    %179 = vector.extract_strided_slice %171 {offsets = [0, 0], sizes = [8, 119], strides = [1, 1]} : vector<8x128xf32> to vector<8x119xf32>
    %180 = tpu.concatenate %178, %179 in 1 : vector<8x9xf32>, vector<8x119xf32> -> vector<8x128xf32>
    %cst_78 = arith.constant 0.000000e+00 : f32
    %181 = vector.broadcast %cst_78 : f32 to vector<8x1xf32>
    %182 = vector.extract_strided_slice %171 {offsets = [0, 0], sizes = [8, 127], strides = [1, 1]} : vector<8x128xf32> to vector<8x127xf32>
    %183 = tpu.concatenate %181, %182 in 1 : vector<8x1xf32>, vector<8x127xf32> -> vector<8x128xf32>
    %184 = vector.extract_strided_slice %171 {offsets = [0, 1], sizes = [8, 127], strides = [1, 1]} : vector<8x128xf32> to vector<8x127xf32>
    %cst_79 = arith.constant 0.000000e+00 : f32
    %185 = vector.broadcast %cst_79 : f32 to vector<8x1xf32>
    %186 = tpu.concatenate %184, %185 in 1 : vector<8x127xf32>, vector<8x1xf32> -> vector<8x128xf32>
    %187 = vector.extract_strided_slice %171 {offsets = [0, 9], sizes = [8, 119], strides = [1, 1]} : vector<8x128xf32> to vector<8x119xf32>
    %cst_80 = arith.constant 0.000000e+00 : f32
    %188 = vector.broadcast %cst_80 : f32 to vector<8x9xf32>
    %189 = tpu.concatenate %187, %188 in 1 : vector<8x119xf32>, vector<8x9xf32> -> vector<8x128xf32>
    %190 = vector.extract_strided_slice %171 {offsets = [0, 10], sizes = [8, 118], strides = [1, 1]} : vector<8x128xf32> to vector<8x118xf32>
    %cst_81 = arith.constant 0.000000e+00 : f32
    %191 = vector.broadcast %cst_81 : f32 to vector<8x10xf32>
    %192 = tpu.concatenate %190, %191 in 1 : vector<8x118xf32>, vector<8x10xf32> -> vector<8x128xf32>
    %193 = vector.extract_strided_slice %171 {offsets = [0, 11], sizes = [8, 117], strides = [1, 1]} : vector<8x128xf32> to vector<8x117xf32>
    %cst_82 = arith.constant 0.000000e+00 : f32
    %194 = vector.broadcast %cst_82 : f32 to vector<8x11xf32>
    %195 = tpu.concatenate %193, %194 in 1 : vector<8x117xf32>, vector<8x11xf32> -> vector<8x128xf32>
    %196 = tpu.concatenate %174, %177, %180, %183, %171, %186, %189, %192, %195 in 0 : vector<8x128xf32>, vector<8x128xf32>, vector<8x128xf32>, vector<8x128xf32>, vector<8x128xf32>, vector<8x128xf32>, vector<8x128xf32>, vector<8x128xf32>, vector<8x128xf32> -> vector<72x128xf32>
    %c4_83 = arith.constant 4 : index
    %c0_84 = arith.constant 0 : index
    %c0_85 = arith.constant 0 : index
    %197 = vector.load %arg6[%c4_83, %c0_84, %c0_85] : memref<6x8x72xf32, #tpu.memory_space<vmem>>, vector<1x8x72xf32>
    %198 = vector.shape_cast %197 : vector<1x8x72xf32> to vector<8x72xf32>
    %cst_86 = arith.constant dense<0.000000e+00> : vector<8x128xf32>
    %199 = tpu.matmul %198, %196, %cst_86 {dimension_numbers = #tpu.dot_dimension_numbers<[1], [0], [0], [1], [0, 0, 1, 1], [], []>} : vector<8x72xf32>, vector<72x128xf32>, vector<8x128xf32> -> vector<8x128xf32>
    %c5 = arith.constant 5 : index
    %c0_87 = arith.constant 0 : index
    %c0_88 = arith.constant 0 : index
    %200 = vector.load %arg7[%c5, %c0_87, %c0_88] : memref<7x8x1xf32, #tpu.memory_space<vmem>>, vector<1x8x1xf32>
    %201 = vector.shape_cast %200 : vector<1x8x1xf32> to vector<8x1xf32>
    %202 = vector.broadcast %201 : vector<8x1xf32> to vector<8x128xf32>
    %203 = arith.addf %199, %202 : vector<8x128xf32>
    %204 = arith.mulf %203, %4 : vector<8x128xf32>
    %cst_89 = arith.constant 0.000000e+00 : f32
    %205 = vector.broadcast %cst_89 : f32 to vector<8x128xf32>
    %206 = arith.maximumf %204, %205 : vector<8x128xf32>
    %cst_90 = arith.constant 0.000000e+00 : f32
    %207 = vector.broadcast %cst_90 : f32 to vector<8x11xf32>
    %208 = vector.extract_strided_slice %206 {offsets = [0, 0], sizes = [8, 117], strides = [1, 1]} : vector<8x128xf32> to vector<8x117xf32>
    %209 = tpu.concatenate %207, %208 in 1 : vector<8x11xf32>, vector<8x117xf32> -> vector<8x128xf32>
    %cst_91 = arith.constant 0.000000e+00 : f32
    %210 = vector.broadcast %cst_91 : f32 to vector<8x10xf32>
    %211 = vector.extract_strided_slice %206 {offsets = [0, 0], sizes = [8, 118], strides = [1, 1]} : vector<8x128xf32> to vector<8x118xf32>
    %212 = tpu.concatenate %210, %211 in 1 : vector<8x10xf32>, vector<8x118xf32> -> vector<8x128xf32>
    %cst_92 = arith.constant 0.000000e+00 : f32
    %213 = vector.broadcast %cst_92 : f32 to vector<8x9xf32>
    %214 = vector.extract_strided_slice %206 {offsets = [0, 0], sizes = [8, 119], strides = [1, 1]} : vector<8x128xf32> to vector<8x119xf32>
    %215 = tpu.concatenate %213, %214 in 1 : vector<8x9xf32>, vector<8x119xf32> -> vector<8x128xf32>
    %cst_93 = arith.constant 0.000000e+00 : f32
    %216 = vector.broadcast %cst_93 : f32 to vector<8x1xf32>
    %217 = vector.extract_strided_slice %206 {offsets = [0, 0], sizes = [8, 127], strides = [1, 1]} : vector<8x128xf32> to vector<8x127xf32>
    %218 = tpu.concatenate %216, %217 in 1 : vector<8x1xf32>, vector<8x127xf32> -> vector<8x128xf32>
    %219 = vector.extract_strided_slice %206 {offsets = [0, 1], sizes = [8, 127], strides = [1, 1]} : vector<8x128xf32> to vector<8x127xf32>
    %cst_94 = arith.constant 0.000000e+00 : f32
    %220 = vector.broadcast %cst_94 : f32 to vector<8x1xf32>
    %221 = tpu.concatenate %219, %220 in 1 : vector<8x127xf32>, vector<8x1xf32> -> vector<8x128xf32>
    %222 = vector.extract_strided_slice %206 {offsets = [0, 9], sizes = [8, 119], strides = [1, 1]} : vector<8x128xf32> to vector<8x119xf32>
    %cst_95 = arith.constant 0.000000e+00 : f32
    %223 = vector.broadcast %cst_95 : f32 to vector<8x9xf32>
    %224 = tpu.concatenate %222, %223 in 1 : vector<8x119xf32>, vector<8x9xf32> -> vector<8x128xf32>
    %225 = vector.extract_strided_slice %206 {offsets = [0, 10], sizes = [8, 118], strides = [1, 1]} : vector<8x128xf32> to vector<8x118xf32>
    %cst_96 = arith.constant 0.000000e+00 : f32
    %226 = vector.broadcast %cst_96 : f32 to vector<8x10xf32>
    %227 = tpu.concatenate %225, %226 in 1 : vector<8x118xf32>, vector<8x10xf32> -> vector<8x128xf32>
    %228 = vector.extract_strided_slice %206 {offsets = [0, 11], sizes = [8, 117], strides = [1, 1]} : vector<8x128xf32> to vector<8x117xf32>
    %cst_97 = arith.constant 0.000000e+00 : f32
    %229 = vector.broadcast %cst_97 : f32 to vector<8x11xf32>
    %230 = tpu.concatenate %228, %229 in 1 : vector<8x117xf32>, vector<8x11xf32> -> vector<8x128xf32>
    %231 = tpu.concatenate %209, %212, %215, %218, %206, %221, %224, %227, %230 in 0 : vector<8x128xf32>, vector<8x128xf32>, vector<8x128xf32>, vector<8x128xf32>, vector<8x128xf32>, vector<8x128xf32>, vector<8x128xf32>, vector<8x128xf32>, vector<8x128xf32> -> vector<72x128xf32>
    %c5_98 = arith.constant 5 : index
    %c0_99 = arith.constant 0 : index
    %c0_100 = arith.constant 0 : index
    %232 = vector.load %arg6[%c5_98, %c0_99, %c0_100] : memref<6x8x72xf32, #tpu.memory_space<vmem>>, vector<1x8x72xf32>
    %233 = vector.shape_cast %232 : vector<1x8x72xf32> to vector<8x72xf32>
    %cst_101 = arith.constant dense<0.000000e+00> : vector<8x128xf32>
    %234 = tpu.matmul %233, %231, %cst_101 {dimension_numbers = #tpu.dot_dimension_numbers<[1], [0], [0], [1], [0, 0, 1, 1], [], []>} : vector<8x72xf32>, vector<72x128xf32>, vector<8x128xf32> -> vector<8x128xf32>
    %c6 = arith.constant 6 : index
    %c0_102 = arith.constant 0 : index
    %c0_103 = arith.constant 0 : index
    %235 = vector.load %arg7[%c6, %c0_102, %c0_103] : memref<7x8x1xf32, #tpu.memory_space<vmem>>, vector<1x8x1xf32>
    %236 = vector.shape_cast %235 : vector<1x8x1xf32> to vector<8x1xf32>
    %237 = vector.broadcast %236 : vector<8x1xf32> to vector<8x128xf32>
    %238 = arith.addf %234, %237 : vector<8x128xf32>
    %239 = arith.mulf %238, %4 : vector<8x128xf32>
    %240 = arith.addf %171, %239 : vector<8x128xf32>
    %c0_104 = arith.constant 0 : index
    %c0_105 = arith.constant 0 : index
    %241 = vector.load %arg3[%c0_104, %c0_105] : memref<128x256xf32, #tpu.memory_space<vmem>>, vector<128x256xf32>
    %cst_106 = arith.constant dense<0.000000e+00> : vector<8x256xf32>
    %242 = tpu.matmul %240, %241, %cst_106 {dimension_numbers = #tpu.dot_dimension_numbers<[1], [0], [0], [1], [0, 0, 1, 1], [], []>} : vector<8x128xf32>, vector<128x256xf32>, vector<8x256xf32> -> vector<8x256xf32>
    %243 = tpu.concatenate %1, %242 in 0 : vector<4x256xf32>, vector<8x256xf32> -> vector<12x256xf32>
    %c0_107 = arith.constant 0 : index
    %c0_108 = arith.constant 0 : index
    %c0_109 = arith.constant 0 : index
    %244 = vector.load %arg8[%c0_107, %c0_108, %c0_109] : memref<1x12x256xf32, #tpu.memory_space<vmem>>, vector<1x12x256xf32>
    %245 = vector.shape_cast %244 : vector<1x12x256xf32> to vector<12x256xf32>
    %246 = vector.shape_cast %243 : vector<12x256xf32> to vector<1x12x256xf32>
    tpu.vector_store %arg8[%c0_107, %c0_108, %c0_109], %246 {strides = array<i32>} : memref<1x12x256xf32, #tpu.memory_space<vmem>>, vector<1x12x256xf32>,
    return
  }
  func.func @transform_0(%arg0: i32) -> (i32, i32, i32) {
    %c0_i32 = arith.constant 0 : i32
    %c0_i32_0 = arith.constant 0 : i32
    %c0_i32_1 = arith.constant 0 : i32
    return %arg0, %c0_i32, %c0_i32_0 : i32, i32, i32
  }
  func.func @transform_1(%arg0: i32) -> (i32, i32) {
    %c0_i32 = arith.constant 0 : i32
    %c0_i32_0 = arith.constant 0 : i32
    %c0_i32_1 = arith.constant 0 : i32
    return %c0_i32, %c0_i32_0 : i32, i32
  }
  func.func @transform_2(%arg0: i32) -> (i32, i32) {
    %c0_i32 = arith.constant 0 : i32
    %c0_i32_0 = arith.constant 0 : i32
    %c0_i32_1 = arith.constant 0 : i32
    return %c0_i32, %c0_i32_0 : i32, i32
  }
  func.func @transform_3(%arg0: i32) -> (i32, i32) {
    %c0_i32 = arith.constant 0 : i32
    %c0_i32_0 = arith.constant 0 : i32
    %c0_i32_1 = arith.constant 0 : i32
    return %c0_i32, %c0_i32_0 : i32, i32
  }
  func.func @transform_4(%arg0: i32) -> (i32, i32) {
    %c0_i32 = arith.constant 0 : i32
    %c0_i32_0 = arith.constant 0 : i32
    %c0_i32_1 = arith.constant 0 : i32
    return %c0_i32, %c0_i32_0 : i32, i32
  }
  func.func @transform_5(%arg0: i32) -> (i32, i32, i32) {
    %c0_i32 = arith.constant 0 : i32
    %c0_i32_0 = arith.constant 0 : i32
    %c0_i32_1 = arith.constant 0 : i32
    %c0_i32_2 = arith.constant 0 : i32
    return %c0_i32, %c0_i32_0, %c0_i32_1 : i32, i32, i32
  }
  func.func @transform_6(%arg0: i32) -> (i32, i32, i32) {
    %c0_i32 = arith.constant 0 : i32
    %c0_i32_0 = arith.constant 0 : i32
    %c0_i32_1 = arith.constant 0 : i32
    %c0_i32_2 = arith.constant 0 : i32
    return %c0_i32, %c0_i32_0, %c0_i32_1 : i32, i32, i32
  }
  func.func @transform_7(%arg0: i32) -> (i32, i32, i32) {
    %c0_i32 = arith.constant 0 : i32
    %c0_i32_0 = arith.constant 0 : i32
    %c0_i32_1 = arith.constant 0 : i32
    return %arg0, %c0_i32, %c0_i32_0 : i32, i32, i32
  }
}

</mosaic_0001>

<bundles_post_ra>
// kernel: first_module_forward.1
= control target key start
LH: loop header
LB: loop body
LE: loop exit
PB: predicated region body
PF: predicated region fallthrough
CT: control target
= control target key end

     0   :  { %12 = vsyncpa [#allocation3], 0  ;;  %s2517_s0 = inlined_call_operand.vmem [shape: f32[2,4,256], index: 0, kind: input, shape index: {}]   ;;  %s2518_s1 = inlined_call_operand.hbm [shape: f32[256,512], index: 1, kind: input, shape index: {}]   ;;  %s2519_s2 = inlined_call_operand.hbm [shape: f32[128,256], index: 2, kind: input, shape index: {}]   ;;  %s2520_s3 = inlined_call_operand.vmem [shape: f32[1,128], index: 3, kind: input, shape index: {}]   ;;  %s2521_s4 = inlined_call_operand.vmem [shape: f32[8,36], index: 4, kind: input, shape index: {}]   ;;  %s2522_s5 = inlined_call_operand.vmem [shape: f32[6,8,72], index: 5, kind: input, shape index: {}]   ;;  %s2523_s6 = inlined_call_operand.vmem [shape: f32[7,8,1], index: 6, kind: input, shape index: {}]   ;;  %s2524_s7 = inlined_call_operand.vmem [shape: f32[2,12,256], index: 7, kind: output, shape index: {}]  }
   0x1   :  { %13 = vsyncpa [#allocation5], 0  ;;  %s2100_s24 = smov 0  }
   0x2 LB: > { %s2043_s25 = smov [#allocation2]   ;;  %s2106_s27 = sadd.s32 4294967295, %s2041_s24   ;;  %s2041_s24 = sphi %s2100_s24, %s19_s24  }
   0x3   : > { %s214_s26 = sshll.u32 %s2043_s25, 4  ;;  %p1616_p0 = scmp.ge.s32.totalorder %s2041_s24, 1  ;;  %s215_s26 = int_to_ptr.vmem [resolvable:$true] %s214_s26 }
   0x4   : > { %p202_p1 = scmp.lt.s32.totalorder %s2041_s24, 3  ;;  %p1943_p3 = scmp.eq.s32.totalorder %s2106_s27, 0 }
   0x5   : > { %s2044_s29 = smov [#allocation4]   ;;  %s1986_s9 = scalar_lea.vmem %s215_s26, 16384 }
   0x6   : > { %p2110_p2 = pnand %p1616_p0, %p202_p1  ;;  %s227_s30 = sshll.u32 %s2044_s29, 4  ;;  %s228_s30 = int_to_ptr.vmem [resolvable:$true] %s227_s30 }
   0x7   : > { %p1987_p7 = scmp.ne.s32.totalorder %s215_s26, %s1986_s9  ;;  %p1994_p10 = scmp.lt.s32.totalorder %s215_s26, %s215_s26 }
   0x8   : > { %p1936_p4 = pneg %p2110_p2  ;;  %p1995_p11 = scmp.lt.s32.totalorder %s1986_s9, %s1986_s9 }
   0xa   : > { %p2119_p5 = pnand %p1943_p3, %p1936_p4  ;;  %p1996_p12 = por %p1995_p11, %p1994_p10 }
   0xc   : > { %p1977_p6 = pneg %p2119_p5 }
   0xe   : > { %p1989_p8 = pnand %p1987_p7, %p1977_p6 }
  0x10   : > { %p1990_p9 = pneg %p1989_p8 }
  0x12   : > { %p1997_p13 = pnand %p1996_p12, %p1990_p9 }
  0x14   : > { %2000 = shalt.err (!%p1997_p13)
}
  0x15   : > { %s2045_s10 = smov 512   ;;  %s2046_s11 = smov 32  }
  0x16   : > { %1939 = dma.hbm_to_vmem [thread:$0]  (!%p2119_p5), %s2518_s1, 16384, %s215_s26, [#allocation3], %s2045_s10, %s2045_s10, %s2046_s11  }
  0x17   : > { %s2012_s14 = scalar_lea.vmem %s228_s30, 4096  ;;  %p2020_p7 = scmp.lt.s32.totalorder %s228_s30, %s228_s30 }
  0x18   : > { %p2013_p0 = scmp.ne.s32.totalorder %s228_s30, %s2012_s14  ;;  %p2021_p8 = scmp.lt.s32.totalorder %s2012_s14, %s2012_s14 }
  0x1a   : > { %p2015_p1 = pnand %p2013_p0, %p1977_p6  ;;  %p2022_p10 = por %p2021_p8, %p2020_p7 }
  0x1c   : > { %p2016_p4 = pneg %p2015_p1 }
  0x1e   : > { %p2023_p9 = pnand %p2022_p10, %p2016_p4 }
  0x20   : > { %2026 = shalt.err (!%p2023_p9)
}
  0x21   : > { %s2047_s15 = smov 256   ;;  %s2048_s16 = smov 16  }
  0x22   : > { %1942 = dma.hbm_to_vmem [thread:$0]  (!%p2119_p5), %s2519_s2, 4096, %s228_s30, [#allocation5], %s2047_s15, %s2047_s15, %s2048_s16  }
  0x23   : > { %263 = sbr.rel (%p2110_p2) target bundleno = 2814 (0xafe), region = 48 }
  0x28   : > { %2032 = dma.done.wait (%p1943_p3), [#allocation3], 16384  }
  0x29   : > { %2034 = vsyncadd (%p1943_p3), [#allocation3], 4294950912 }
  0x2a   : > { %2036 = dma.done.wait (%p1943_p3), [#allocation5], 4096  }
  0x2b   : > { %2038 = vsyncadd (%p1943_p3), [#allocation5], 4294963200  ;;  %v378_v0 = vld [vmem:[#allocation2 + $0x1e8] sm:$0xff]  ;;  %v380_v1 = vld [vmem:[#allocation2 + $0x1f8] sm:$0xff]  ;;  %p299_p2 = scmp.lt.s32.totalorder %s2106_s27, 1  ;;  %vm626_vm0 = vcmask 1043456  }
  0x2c   : > { %v377_v2 = vld [vmem:[#allocation2 + $0x1e0] sm:$0xff]  ;;  %448 = vmatprep.subr.mxu0 %v378_v0  ;;  %519 = vmatprep.subr.mxu1 %v380_v1  ;;  %v379_v3 = vld [vmem:[#allocation2 + $0x1f0] sm:$0xff]  ;;  %v374_v4 = vld [vmem:[#allocation2 + $0x1c8] sm:$0xff]  ;;  %vm2050_vm1 = vmmov 0   ;;  %s2051_s23 = smov 10   ;;  %s2053_s25 = smov 1  }
  0x2d   : > { %v376_v5 = vld [vmem:[#allocation2 + $0x1d8] sm:$0xff]  ;;  %449 = vmatpush1.msra.mxu0 %v377_v2  ;;  %520 = vmatpush1.msra.mxu1 %v379_v3  ;;  %v373_v6 = vld [vmem:[#allocation2 + $0x1c0] sm:$0xff]  ;;  %v375_v7 = vld [vmem:[#allocation2 + $0x1d0] sm:$0xff]  ;;  %s2536_s27 = smov (!%p299_p2, %s2106_s27), 1  ;;  %s2054_s29 = smov 11   ;;  %vm610_vm2 = vcmask 7168  }
  0x2e   : > { %v370_v8 = vld [vmem:[#allocation2 + $0x1a8] sm:$0xff]  ;;  %450 = vmatprep.subr.mxu0 %v374_v4  ;;  %521 = vmatprep.subr.mxu1 %v376_v5  ;;  %v372_v9 = vld [vmem:[#allocation2 + $0x1b8] sm:$0xff]  ;;  %v369_v10 = vld [vmem:[#allocation2 + $0x1a0] sm:$0xff]  ;;  %s1721_s19 = sshll.u32 %s2536_s27, 3  ;;  %vm600_vm3 = vcmask 80896   ;;  %vm594_vm4 = vcmask 89088  }
  0x2f   : > { %v371_v11 = vld [vmem:[#allocation2 + $0x1b0] sm:$0xff]  ;;  %451 = vmatpush1.msra.mxu0 %v373_v6  ;;  %522 = vmatpush1.msra.mxu1 %v375_v7  ;;  %v366_v12 = vld [vmem:[#allocation2 + $0x188] sm:$0xff]  ;;  %v368_v13 = vld [vmem:[#allocation2 + $0x198] sm:$0xff]  ;;  %s303_s22 = scalar_lea.vmem %s2517_s0, %s1721_s19  ;;  %vm638_vm5 = vcmask 293888   ;;  %s2055_s11 = smov 118   ;;  %vm751_vm6 = vcmask 957440  }
  0x30   : > { %452 = vmatprep.subr.mxu0 %v370_v8  ;;  %523 = vmatprep.subr.mxu1 %v372_v9  ;;  %v365_v14 = vld [vmem:[#allocation2 + $0x180] sm:$0xff]  ;;  %v367_v15 = vld [vmem:[#allocation2 + $0x190] sm:$0xff]  ;;  %v362_v16 = vld [vmem:[#allocation2 + $0x168] sm:$0xff]  ;;  %s2056_s12 = smov 117   ;;  %s2057_s13 = smov 127   ;;  %vm746_vm7 = vcmask 965632  }
  0x31   : > { %453 = vmatpush1.msra.mxu0 %v369_v10  ;;  %524 = vmatpush1.msra.mxu1 %v371_v11  ;;  %v364_v17 = vld [vmem:[#allocation2 + $0x178] sm:$0xff]  ;;  %v361_v18 = vld [vmem:[#allocation2 + $0x160] sm:$0xff]  ;;  %v363_v19 = vld [vmem:[#allocation2 + $0x170] sm:$0xff]  ;;  %s2058_s14 = smov 119   ;;  %s2059_s15 = smov 9   ;;  %vm741_vm8 = vcmask 973824  }
  0x32   : > { %454 = vmatprep.subr.mxu0 %v366_v12  ;;  %525 = vmatprep.subr.mxu1 %v368_v13  ;;  %v358_v20 = vld [vmem:[#allocation2 + $0x148] sm:$0xff]  ;;  %v360_v21 = vld [vmem:[#allocation2 + $0x158] sm:$0xff]  ;;  %v357_v22 = vld [vmem:[#allocation2 + $0x140] sm:$0xff]  ;;  %vm736_vm9 = vcmask 1039360   ;;  %vm727_vm10 = vcmask 72704   ;;  %vm761_vm15 = vcmask 588800  }
  0x33   : > { %455 = vmatpush1.msra.mxu0 %v365_v14  ;;  %526 = vmatpush1.msra.mxu1 %v367_v15  ;;  %v359_v23 = vld [vmem:[#allocation2 + $0x150] sm:$0xff]  ;;  %v354_v24 = vld [vmem:[#allocation2 + $0x128] sm:$0xff]  ;;  %v356_v25 = vld [vmem:[#allocation2 + $0x138] sm:$0xff] }
  0x34   : > { %456 = vmatprep.subr.mxu0 %v362_v16  ;;  %527 = vmatprep.subr.mxu1 %v364_v17  ;;  %v353_v26 = vld [vmem:[#allocation2 + $0x120] sm:$0xff]  ;;  %v355_v27 = vld [vmem:[#allocation2 + $0x130] sm:$0xff]  ;;  %v350_v28 = vld [vmem:[#allocation2 + $0x108] sm:$0xff] }
  0x35   : > { %457 = vmatpush1.msra.mxu0 %v361_v18  ;;  %528 = vmatpush1.msra.mxu1 %v363_v19  ;;  %v352_v29 = vld [vmem:[#allocation2 + $0x118] sm:$0xff]  ;;  %v349_v30 = vld [vmem:[#allocation2 + $0x100] sm:$0xff]  ;;  %v351_v31 = vld [vmem:[#allocation2 + $0x110] sm:$0xff] }
  0x36   : > { %458 = vmatprep.subr.mxu0 %v358_v20  ;;  %529 = vmatprep.subr.mxu1 %v360_v21  ;;  %v346_v32 = vld [vmem:[#allocation2 + $0xe8] sm:$0xff]  ;;  %v348_v33 = vld [vmem:[#allocation2 + $0xf8] sm:$0xff]  ;;  %v345_v34 = vld [vmem:[#allocation2 + $0xe0] sm:$0xff] }
  0x37   : > { %459 = vmatpush1.msra.mxu0 %v357_v22  ;;  %530 = vmatpush1.msra.mxu1 %v359_v23  ;;  %v347_v35 = vld [vmem:[#allocation2 + $0xf0] sm:$0xff]  ;;  %v342_v36 = vld [vmem:[#allocation2 + $0xc8] sm:$0xff]  ;;  %v344_v37 = vld [vmem:[#allocation2 + $0xd8] sm:$0xff] }
  0x38   : > { %460 = vmatprep.subr.mxu0 %v354_v24  ;;  %531 = vmatprep.subr.mxu1 %v356_v25  ;;  %v341_v38 = vld [vmem:[#allocation2 + $0xc0] sm:$0xff]  ;;  %v343_v39 = vld [vmem:[#allocation2 + $0xd0] sm:$0xff]  ;;  %v338_v40 = vld [vmem:[#allocation2 + $0xa8] sm:$0xff] }
  0x39   : > { %461 = vmatpush1.msra.mxu0 %v353_v26  ;;  %532 = vmatpush1.msra.mxu1 %v355_v27  ;;  %v340_v41 = vld [vmem:[#allocation2 + $0xb8] sm:$0xff]  ;;  %v337_v42 = vld [vmem:[#allocation2 + $0xa0] sm:$0xff]  ;;  %v339_v43 = vld [vmem:[#allocation2 + $0xb0] sm:$0xff] }
  0x3a   : > { %462 = vmatprep.subr.mxu0 %v350_v28  ;;  %533 = vmatprep.subr.mxu1 %v352_v29  ;;  %v334_v44 = vld [vmem:[#allocation2 + $0x88] sm:$0xff]  ;;  %v336_v45 = vld [vmem:[#allocation2 + $0x98] sm:$0xff]  ;;  %v333_v46 = vld [vmem:[#allocation2 + $0x80] sm:$0xff] }
  0x3b   : > { %463 = vmatpush1.msra.mxu0 %v349_v30  ;;  %534 = vmatpush1.msra.mxu1 %v351_v31  ;;  %v335_v47 = vld [vmem:[#allocation2 + $0x90] sm:$0xff]  ;;  %v330_v48 = vld [vmem:[#allocation2 + $0x68] sm:$0xff]  ;;  %v332_v49 = vld [vmem:[#allocation2 + $0x78] sm:$0xff] }
  0x3c   : > { %464 = vmatprep.subr.mxu0 %v346_v32  ;;  %535 = vmatprep.subr.mxu1 %v348_v33  ;;  %v329_v50 = vld [vmem:[#allocation2 + $0x60] sm:$0xff]  ;;  %v331_v51 = vld [vmem:[#allocation2 + $0x70] sm:$0xff]  ;;  %v326_v52 = vld [vmem:[#allocation2 + $0x48] sm:$0xff] }
  0x3d   : > { %465 = vmatpush1.msra.mxu0 %v345_v34  ;;  %536 = vmatpush1.msra.mxu1 %v347_v35  ;;  %v328_v53 = vld [vmem:[#allocation2 + $0x58] sm:$0xff]  ;;  %v325_v54 = vld [vmem:[#allocation2 + $0x40] sm:$0xff]  ;;  %v327_v55 = vld [vmem:[#allocation2 + $0x50] sm:$0xff] }
  0x3e   : > { %466 = vmatprep.subr.mxu0 %v342_v36  ;;  %537 = vmatprep.subr.mxu1 %v344_v37  ;;  %v322_v56 = vld [vmem:[#allocation2 + $0x28] sm:$0xff]  ;;  %v324_v57 = vld [vmem:[#allocation2 + $0x38] sm:$0xff]  ;;  %v321_v58 = vld [vmem:[#allocation2 + $0x20] sm:$0xff] }
  0x3f   : > { %467 = vmatpush1.msra.mxu0 %v341_v38  ;;  %538 = vmatpush1.msra.mxu1 %v343_v39  ;;  %v323_v59 = vld [vmem:[#allocation2 + $0x30] sm:$0xff]  ;;  %v318_v60 = vld [vmem:[#allocation2 + $0x8] sm:$0xff]  ;;  %v320_v61 = vld [vmem:[#allocation2 + $0x18] sm:$0xff] }
  0x40   : > { %468 = vmatprep.subr.mxu0 %v338_v40  ;;  %539 = vmatprep.subr.mxu1 %v340_v41  ;;  %v317_v62 = vld [vmem:[#allocation2] sm:$0xff]  ;;  %v319_v63 = vld [vmem:[#allocation2 + $0x10] sm:$0xff]  ;;  %v442_v0 = vld [vmem:[#allocation2 + $0x3e8] sm:$0xff] }
  0x41   : > { %469 = vmatpush1.msra.mxu0 %v337_v42  ;;  %540 = vmatpush1.msra.mxu1 %v339_v43  ;;  %v444_v1 = vld [vmem:[#allocation2 + $0x3f8] sm:$0xff]  ;;  %v441_v2 = vld [vmem:[#allocation2 + $0x3e0] sm:$0xff]  ;;  %v443_v3 = vld [vmem:[#allocation2 + $0x3f0] sm:$0xff] }
  0x42   : > { %470 = vmatprep.subr.mxu0 %v334_v44  ;;  %541 = vmatprep.subr.mxu1 %v336_v45  ;;  %v438_v4 = vld [vmem:[#allocation2 + $0x3c8] sm:$0xff]  ;;  %v440_v5 = vld [vmem:[#allocation2 + $0x3d8] sm:$0xff]  ;;  %v437_v6 = vld [vmem:[#allocation2 + $0x3c0] sm:$0xff] }
  0x43   : > { %471 = vmatpush1.msra.mxu0 %v333_v46  ;;  %542 = vmatpush1.msra.mxu1 %v335_v47  ;;  %v439_v7 = vld [vmem:[#allocation2 + $0x3d0] sm:$0xff]  ;;  %v434_v8 = vld [vmem:[#allocation2 + $0x3a8] sm:$0xff]  ;;  %v436_v9 = vld [vmem:[#allocation2 + $0x3b8] sm:$0xff] }
  0x44   : > { %472 = vmatprep.subr.mxu0 %v330_v48  ;;  %543 = vmatprep.subr.mxu1 %v332_v49  ;;  %v433_v10 = vld [vmem:[#allocation2 + $0x3a0] sm:$0xff]  ;;  %v435_v11 = vld [vmem:[#allocation2 + $0x3b0] sm:$0xff]  ;;  %v430_v12 = vld [vmem:[#allocation2 + $0x388] sm:$0xff] }
  0x45   : > { %473 = vmatpush1.msra.mxu0 %v329_v50  ;;  %544 = vmatpush1.msra.mxu1 %v331_v51  ;;  %v432_v13 = vld [vmem:[#allocation2 + $0x398] sm:$0xff]  ;;  %v429_v14 = vld [vmem:[#allocation2 + $0x380] sm:$0xff]  ;;  %v431_v15 = vld [vmem:[#allocation2 + $0x390] sm:$0xff] }
  0x46   : > { %474 = vmatprep.subr.mxu0 %v326_v52  ;;  %545 = vmatprep.subr.mxu1 %v328_v53  ;;  %v426_v16 = vld [vmem:[#allocation2 + $0x368] sm:$0xff]  ;;  %v428_v17 = vld [vmem:[#allocation2 + $0x378] sm:$0xff]  ;;  %v425_v18 = vld [vmem:[#allocation2 + $0x360] sm:$0xff] }
  0x47   : > { %475 = vmatpush1.msra.mxu0 %v325_v54  ;;  %546 = vmatpush1.msra.mxu1 %v327_v55  ;;  %v427_v19 = vld [vmem:[#allocation2 + $0x370] sm:$0xff]  ;;  %v422_v20 = vld [vmem:[#allocation2 + $0x348] sm:$0xff]  ;;  %v424_v21 = vld [vmem:[#allocation2 + $0x358] sm:$0xff] }
  0x48   : > { %476 = vmatprep.subr.mxu0 %v322_v56  ;;  %547 = vmatprep.subr.mxu1 %v324_v57  ;;  %v421_v22 = vld [vmem:[#allocation2 + $0x340] sm:$0xff]  ;;  %v423_v23 = vld [vmem:[#allocation2 + $0x350] sm:$0xff]  ;;  %v418_v24 = vld [vmem:[#allocation2 + $0x328] sm:$0xff] }
  0x49   : > { %477 = vmatpush1.msra.mxu0 %v321_v58  ;;  %548 = vmatpush1.msra.mxu1 %v323_v59  ;;  %v420_v25 = vld [vmem:[#allocation2 + $0x338] sm:$0xff]  ;;  %v417_v26 = vld [vmem:[#allocation2 + $0x320] sm:$0xff]  ;;  %v419_v27 = vld [vmem:[#allocation2 + $0x330] sm:$0xff] }
  0x4a   : > { %478 = vmatprep.subr.mxu0 %v318_v60  ;;  %549 = vmatprep.subr.mxu1 %v320_v61  ;;  %v414_v28 = vld [vmem:[#allocation2 + $0x308] sm:$0xff]  ;;  %v416_v29 = vld [vmem:[#allocation2 + $0x318] sm:$0xff]  ;;  %v413_v30 = vld [vmem:[#allocation2 + $0x300] sm:$0xff] }
  0x4b   : > { %479 = vmatpush1.msra.mxu0 %v317_v62  ;;  %550 = vmatpush1.msra.mxu1 %v319_v63  ;;  %v415_v31 = vld [vmem:[#allocation2 + $0x310] sm:$0xff]  ;;  %v410_v32 = vld [vmem:[#allocation2 + $0x2e8] sm:$0xff]  ;;  %v412_v33 = vld [vmem:[#allocation2 + $0x2f8] sm:$0xff] }
  0x4c   : > { %480 = vmatprep.subr.mxu0 %v442_v0  ;;  %551 = vmatprep.subr.mxu1 %v444_v1  ;;  %v409_v34 = vld [vmem:[#allocation2 + $0x2e0] sm:$0xff]  ;;  %v411_v35 = vld [vmem:[#allocation2 + $0x2f0] sm:$0xff]  ;;  %v406_v36 = vld [vmem:[#allocation2 + $0x2c8] sm:$0xff] }
  0x4d   : > { %481 = vmatpush2.msra.mxu0 %v441_v2  ;;  %552 = vmatpush2.msra.mxu1 %v443_v3  ;;  %v408_v37 = vld [vmem:[#allocation2 + $0x2d8] sm:$0xff]  ;;  %v405_v38 = vld [vmem:[#allocation2 + $0x2c0] sm:$0xff]  ;;  %v407_v39 = vld [vmem:[#allocation2 + $0x2d0] sm:$0xff]  ;;  %v2049_v2 = vmov 0.0  }
  0x4e   : > { %482 = vmatprep.subr.mxu0 %v438_v4  ;;  %553 = vmatprep.subr.mxu1 %v440_v5  ;;  %v402_v40 = vld [vmem:[#allocation2 + $0x2a8] sm:$0xff]  ;;  %v404_v41 = vld [vmem:[#allocation2 + $0x2b8] sm:$0xff]  ;;  %v401_v42 = vld [vmem:[#allocation2 + $0x2a0] sm:$0xff] }
  0x4f   : > { %483 = vmatpush2.msra.mxu0 %v437_v6  ;;  %554 = vmatpush2.msra.mxu1 %v439_v7  ;;  %v403_v43 = vld [vmem:[#allocation2 + $0x2b0] sm:$0xff]  ;;  %v398_v44 = vld [vmem:[#allocation2 + $0x288] sm:$0xff]  ;;  %v400_v45 = vld [vmem:[#allocation2 + $0x298] sm:$0xff]  ;;  %v2052_v6 = vmov 0  }
  0x50   : > { %484 = vmatprep.subr.mxu0 %v434_v8  ;;  %555 = vmatprep.subr.mxu1 %v436_v9  ;;  %v397_v46 = vld [vmem:[#allocation2 + $0x280] sm:$0xff]  ;;  %v399_v47 = vld [vmem:[#allocation2 + $0x290] sm:$0xff]  ;;  %v394_v48 = vld [vmem:[#allocation2 + $0x268] sm:$0xff] }
  0x51   : > { %485 = vmatpush2.msra.mxu0 %v433_v10  ;;  %556 = vmatpush2.msra.mxu1 %v435_v11  ;;  %v396_v49 = vld [vmem:[#allocation2 + $0x278] sm:$0xff]  ;;  %v393_v50 = vld [vmem:[#allocation2 + $0x260] sm:$0xff]  ;;  %v395_v51 = vld [vmem:[#allocation2 + $0x270] sm:$0xff] }
  0x52   : > { %486 = vmatprep.subr.mxu0 %v430_v12  ;;  %557 = vmatprep.subr.mxu1 %v432_v13  ;;  %v390_v52 = vld [vmem:[#allocation2 + $0x248] sm:$0xff]  ;;  %v392_v53 = vld [vmem:[#allocation2 + $0x258] sm:$0xff]  ;;  %v389_v54 = vld [vmem:[#allocation2 + $0x240] sm:$0xff] }
  0x53   : > { %487 = vmatpush2.msra.mxu0 %v429_v14  ;;  %558 = vmatpush2.msra.mxu1 %v431_v15  ;;  %v391_v55 = vld [vmem:[#allocation2 + $0x250] sm:$0xff]  ;;  %v2161_v56 = vld [vmem:[%s303_s22] sm:$0xff]  ;;  %v386_v57 = vld [vmem:[#allocation2 + $0x228] sm:$0xff] }
  0x54   : > { %488 = vmatprep.subr.mxu0 %v426_v16  ;;  %559 = vmatprep.subr.mxu1 %v428_v17  ;;  %v388_v58 = vld [vmem:[#allocation2 + $0x238] sm:$0xff]  ;;  %v385_v59 = vld [vmem:[#allocation2 + $0x220] sm:$0xff]  ;;  %v387_v60 = vld [vmem:[#allocation2 + $0x230] sm:$0xff]  ;;  %v2165_v63 = vcombine.high %v2161_v56, %v2161_v56 }
  0x55   : > { %489 = vmatpush2.msra.mxu0 %v425_v18  ;;  %560 = vmatpush2.msra.mxu1 %v427_v19  ;;  %v382_v61 = vld [vmem:[#allocation2 + $0x208] sm:$0xff]  ;;  %v384_v62 = vld [vmem:[#allocation2 + $0x218] sm:$0xff]  ;;  %v381_v0 = vld [vmem:[#allocation2 + $0x200] sm:$0xff] }
  0x56   : > { %490 = vmatprep.subr.mxu0 %v422_v20  ;;  %561 = vmatprep.subr.mxu1 %v424_v21  ;;  %v383_v1 = vld [vmem:[#allocation2 + $0x210] sm:$0xff]  ;;  %v632_v8 = vld [vmem:[%s2523_s6] sm:$0xff]  ;;  %vm2240_vm11 = vmneg %vm610_vm2 }
  0x57   : > { %491 = vmatpush2.msra.mxu0 %v421_v22  ;;  %562 = vmatpush2.msra.mxu1 %v423_v23  ;;  %vm2247_vm12 = vmneg %vm727_vm10 }
  0x58   : > { %492 = vmatprep.subr.mxu0 %v418_v24  ;;  %563 = vmatprep.subr.mxu1 %v420_v25  ;;  %vm2254_vm13 = vmneg %vm600_vm3 }
  0x59   : > { %493 = vmatpush2.msra.mxu0 %v417_v26  ;;  %564 = vmatpush2.msra.mxu1 %v419_v27  ;;  %v631_v26 = vld [vmem:[%s2521_s4] sm:$0xff]  ;;  %vm2262_vm14 = vmneg %vm594_vm4 }
  0x5a   : > { %494 = vmatprep.subr.mxu0 %v414_v28  ;;  %565 = vmatprep.subr.mxu1 %v416_v29  ;;  %v2208_v29 = vld [vmem:[%s2520_s3] ss:$0 sm:$0xff] }
  0x5b   : > { %495 = vmatpush2.msra.mxu0 %v413_v30  ;;  %566 = vmatpush2.msra.mxu1 %v415_v31 }
  0x5c   : > { %496 = vmatprep.subr.mxu0 %v410_v32  ;;  %567 = vmatprep.subr.mxu1 %v412_v33 }
  0x5d   : > { %497 = vmatpush2.msra.mxu0 %v409_v34  ;;  %568 = vmatpush2.msra.mxu1 %v411_v35  ;;  %v1630_v34 = vld [vmem:[%s2523_s6 + $0x8] sm:$0xff] }
  0x5e   : > { %498 = vmatprep.subr.mxu0 %v406_v36  ;;  %569 = vmatprep.subr.mxu1 %v408_v37 }
  0x5f   : > { %499 = vmatpush2.msra.mxu0 %v405_v38  ;;  %570 = vmatpush2.msra.mxu1 %v407_v39  ;;  %v1428_v39 = vld [vmem:[#allocation4 + $0x30] sm:$0xff] }
  0x60   : > { %500 = vmatprep.subr.mxu0 %v402_v40  ;;  %571 = vmatprep.subr.mxu1 %v404_v41 }
  0x61   : > { %501 = vmatpush2.msra.mxu0 %v401_v42  ;;  %572 = vmatpush2.msra.mxu1 %v403_v43  ;;  %v1427_v42 = vld [vmem:[#allocation4 + $0x28] sm:$0xff]  ;;  %v1425_v43 = vld [vmem:[#allocation4 + $0x18] sm:$0xff] }
  0x62   : > { %502 = vmatprep.subr.mxu0 %v398_v44  ;;  %573 = vmatprep.subr.mxu1 %v400_v45 }
  0x63   : > { %503 = vmatpush2.msra.mxu0 %v397_v46  ;;  %574 = vmatpush2.msra.mxu1 %v399_v47  ;;  %v753_v46 = vld [vmem:[%s2522_s5] sm:$0xff] }
  0x64   : > { %504 = vmatprep.subr.mxu0 %v394_v48  ;;  %575 = vmatprep.subr.mxu1 %v396_v49 }
  0x65   : > { %505 = vmatpush2.msra.mxu0 %v393_v50  ;;  %576 = vmatpush2.msra.mxu1 %v395_v51 }
  0x66   : > { %506 = vmatprep.subr.mxu0 %v390_v52  ;;  %577 = vmatprep.subr.mxu1 %v392_v53 }
  0x67   : > { %507 = vmatpush2.msra.mxu0 %v389_v54  ;;  %578 = vmatpush2.msra.mxu1 %v391_v55  ;;  %v1645_v54 = vld [vmem:[%s2523_s6 + $0x10] sm:$0xff] }
  0x68   : > { %508 = vmatprep.subr.mxu0 %v386_v57  ;;  %579 = vmatprep.subr.mxu1 %v388_v58 }
  0x69   : > { %509 = vmatpush2.msra.mxu0 %v385_v59  ;;  %580 = vmatpush2.msra.mxu1 %v387_v60 }
  0x6a   : > { %510 = vmatprep.subr.mxu0 %v382_v61  ;;  %581 = vmatprep.subr.mxu1 %v384_v62 }
  0x6b   : > { %511 = vmatpush2.msra.mxu0 %v381_v0  ;;  %512 = vmatprep.mubr.f32.mxu0 %v2165_v63  ;;  %v1644_v0 = vld [vmem:[%s2522_s5 + $0x8] sm:$0xff] }
  0x6c   : > { %582 = vmatpush2.msra.mxu1 %v383_v1  ;;  %583 = vmatprep.mubr.f32.mxu1 %v2165_v63 }
  0x6d   : > { %513 = vmatmul.mubr.f32.vlgmr.msra.gmra.mxu0 %v2161_v56  ;;  %584 = vmatmul.mubr.f32.vlgmr.msra.gmra.mxu1 %v2161_v56 }
  0x6e   : > { %1789 = vmatprep.subr.mxu1 %v2049_v2  ;;  %1802 = vmatprep.subr.mxu0 %v2049_v2 }
  0x6f   : > { %1799 = vmatprep.mubr.msk.f32.mxu1 %vm2050_vm1, %v2049_v2  ;;  %1820 = vmatprep.mubr.msk.f32.mxu0 %vm2050_vm1, %v2049_v2 }
  0x70   : > { %1972 = vset.pattern.permute.xlu1 %v2052_v6  ;;  %1973 = vset.pattern.permute.xlu0 %v2052_v6 }
 0x12d   : > { %v585_v3 = vpop.f32.mrf.mxu1  ;;  %v514_v4 = vpop.f32.mrf.mxu0 }
 0x12e   : > { %597 = vrot.lane.b32.xlu1 %v585_v3, %s2051_s23  ;;  %v624_v10 = vrot.slane %v585_v3, 4 }
 0x12f   : > { %v587_v5 = vpop.f32.mrf.mxu1  ;;  %v516_v7 = vpop.f32.mrf.mxu0 }
 0x130   : > { %612 = vrot.lane.b32.xlu0 %v587_v5, %s2053_s25  ;;  %1790 = vmatpush3.msk.msra.mxu1 %vm626_vm0, %v587_v5  ;;  %v622_v11 = vrot.slane %v516_v7, 4 }
 0x131   : > { %1791 = vmatprep.subr.mxu1 %v2049_v2 }
 0x132   : > { %602 = vrot.lane.b32.xlu1 %v587_v5, %s2051_s23  ;;  %v629_v17 = vsel %vm626_vm0, %v514_v4, %v622_v11 }
 0x134   : > { %607 = vrot.lane.b32.xlu0 %v516_v7, %s2053_s25 }
 0x136   : > { %635 = vperm.xlu1 %1972, %v632_v8  }
 0x138   : > { %591 = vrot.lane.b32.xlu0 %v587_v5, %s2054_s29 }
 0x1a0   : > { %v598_v9 = vpop.permute.xlu1 %597 }
 0x1a1   : > { %v601_v18 = vsel %vm600_vm3, 0.0, %v598_v9  ;;  %v1660_v9 = vld [vmem:[%s2523_s6 + $0x18] sm:$0xff] }
 0x1a2   : > { %v613_v12 = vpop.permute.xlu0 %612  ;;  %v617_v22 = vrot.slane %v601_v18, 4 }
 0x1a3   : > { %v615_v13 = vsel %vm610_vm2, 0.0, %v613_v12 }
 0x1a4   : > { %v630_v14 = vsel %vm626_vm0, %v615_v13, %v624_v10  ;;  %v603_v15 = vpop.permute.xlu1 %602 }
 0x1a5   : > { %1792 = vmatpush3.msra.mxu1 %v630_v14  ;;  %v605_v21 = vsel %vm600_vm3, 0.0, %v603_v15 }
 0x1a6   : > { %1793 = vmatprep.subr.mxu1 %v2049_v2  ;;  %v608_v16 = vpop.permute.xlu0 %607 }
 0x1a7   : > { %v611_v19 = vsel %vm610_vm2, 0.0, %v608_v16  ;;  %1794 = vmatpush3.msra.mxu1 %v629_v17  ;;  %v1659_v17 = vld [vmem:[%s2522_s5 + $0x10] sm:$0xff] }
 0x1a8   : > { %v620_v20 = vrot.slane %v611_v19, 4  ;;  %1795 = vmatprep.subr.mxu1 %v2049_v2 }
 0x1aa   : > { %v592_v23 = vpop.permute.xlu0 %591  ;;  %v628_v24 = vsel %vm626_vm0, %v605_v21, %v620_v20 }
 0x1ab   : > { %v595_v25 = vsel %vm594_vm4, 0.0, %v592_v23  ;;  %1796 = vmatpush3.msra.mxu1 %v628_v24 }
 0x1ac   : > { %v627_v27 = vsel %vm626_vm0, %v595_v25, %v617_v22  ;;  %1797 = vmatprep.subr.mxu1 %v2049_v2  ;;  %v1675_v25 = vld [vmem:[%s2523_s6 + $0x20] sm:$0xff] }
 0x1ad   : > { %1798 = vmatpush3.msra.mxu1 %v627_v27 }
 0x1ae   : > { %1800 = vmatmul.mubr.msk.f32.vlgmr.msra.gmra.mxu1 %vm638_vm5, %v631_v26  ;;  %1844 = vmatprep.subr.mxu1 %v2049_v2 }
 0x1af   : > { %1862 = vmatprep.mubr.msk.f32.mxu1 %vm2050_vm1, %v2049_v2 }
 0x1b1   : > { %v636_v28 = vpop.permute.xlu1 %635 }
 0x26e   : > { %v710_v30 = vpop.f32.mrf.mxu1 }
 0x26f   : > { %v711_v31 = vadd.f32 %v710_v30, %v636_v28 }
 0x270   : > { %v1801_v32 = vpop.f32.mrf.mxu1 }
 0x271   : > { %v2211_v33 = vmul.f32 %v2208_v29, %v711_v31 }
 0x273   : > { %743 = vrot.lane.b32.xlu1 %v2211_v33, %s2055_s11  ;;  %748 = vrot.lane.b32.xlu0 %v2211_v33, %s2056_s12 }
 0x277   : > { %733 = vrot.lane.b32.xlu1 %v2211_v33, %s2057_s13  ;;  %738 = vrot.lane.b32.xlu0 %v2211_v33, %s2058_s14 }
 0x27b   : > { %724 = vrot.lane.b32.xlu1 %v2211_v33, %s2059_s15  ;;  %729 = vrot.lane.b32.xlu0 %v2211_v33, %s2053_s25 }
 0x27f   : > { %716 = vrot.lane.b32.xlu1 %v2211_v33, %s2054_s29  ;;  %720 = vrot.lane.b32.xlu0 %v2211_v33, %s2051_s23 }
 0x283   : > { %758 = vperm.xlu0 %1973, %v1630_v34   ;;  %v1674_v34 = vld [vmem:[%s2522_s5 + $0x18] sm:$0xff] }
 0x2e5   : > { %v744_v35 = vpop.permute.xlu1 %743  ;;  %v749_v36 = vpop.permute.xlu0 %748 }
 0x2e6   : > { %1803 = vmatpush3.msk.msra.mxu0 %vm751_vm6, %v749_v36 }
 0x2e7   : > { %1804 = vmatprep.subr.mxu0 %v2049_v2 }
 0x2e8   : > { %1805 = vmatpush3.msk.msra.mxu0 %vm746_vm7, %v744_v35 }
 0x2e9   : > { %v734_v37 = vpop.permute.xlu1 %733  ;;  %1806 = vmatprep.subr.mxu0 %v2049_v2  ;;  %v739_v38 = vpop.permute.xlu0 %738 }
 0x2ea   : > { %1807 = vmatpush3.msk.msra.mxu0 %vm741_vm8, %v739_v38 }
 0x2eb   : > { %1808 = vmatprep.subr.mxu0 %v2049_v2 }
 0x2ec   : > { %1809 = vmatpush3.msk.msra.mxu0 %vm736_vm9, %v734_v37 }
 0x2ed   : > { %1810 = vmatprep.subr.mxu0 %v2049_v2  ;;  %v730_v40 = vpop.permute.xlu0 %729  ;;  %v725_v41 = vpop.permute.xlu1 %724 }
 0x2ee   : > { %1811 = vmatpush3.msra.mxu0 %v2211_v33 }
 0x2ef   : > { %1812 = vmatprep.subr.mxu0 %v2049_v2 }
 0x2f0   : > { %1813 = vmatpush3.msk.msra.mxu0 %vm2240_vm11, %v730_v40 }
 0x2f1   : > { %1814 = vmatprep.subr.mxu0 %v2049_v2  ;;  %v721_v45 = vpop.permute.xlu0 %720  ;;  %v717_v47 = vpop.permute.xlu1 %716 }
 0x2f2   : > { %1815 = vmatpush3.msk.msra.mxu0 %vm2247_vm12, %v725_v41 }
 0x2f3   : > { %1816 = vmatprep.subr.mxu0 %v2049_v2 }
 0x2f4   : > { %1817 = vmatpush3.msk.msra.mxu0 %vm2254_vm13, %v721_v45 }
 0x2f5   : > { %1818 = vmatprep.subr.mxu0 %v2049_v2 }
 0x2f6   : > { %1819 = vmatpush3.msk.msra.mxu0 %vm2262_vm14, %v717_v47 }
 0x2f7   : > { %1821 = vmatmul.mubr.msk.f32.vlgmr.msra.gmra.mxu0 %vm761_vm15, %v753_v46  ;;  %1823 = vmatprep.subr.mxu0 %v2049_v2  ;;  %v1690_v46 = vld [vmem:[%s2523_s6 + $0x28] sm:$0xff] }
 0x2f8   : > { %1841 = vmatprep.mubr.msk.f32.mxu0 %vm2050_vm1, %v2049_v2 }
 0x2fe   : > { %v759_v48 = vpop.permute.xlu0 %758 }
 0x3b7   : > { %v831_v49 = vpop.f32.mrf.mxu0 }
 0x3b8   : > { %v832_v50 = vadd.f32 %v831_v49, %v759_v48 }
 0x3b9   : > { %v1822_v51 = vpop.f32.mrf.mxu0 }
 0x3ba   : > { %v835_v52 = vmul.f32 %v2208_v29, %v832_v50 }
 0x3bc   : > { %v836_v53 = vmax.f32 %v835_v52, 0.0 }
 0x3be   : > { %858 = vrot.lane.b32.xlu0 %v836_v53, %s2058_s14  ;;  %866 = vrot.lane.b32.xlu1 %v836_v53, %s2056_s12 }
 0x3c2   : > { %850 = vrot.lane.b32.xlu0 %v836_v53, %s2053_s25  ;;  %862 = vrot.lane.b32.xlu1 %v836_v53, %s2055_s11 }
 0x3c6   : > { %842 = vrot.lane.b32.xlu0 %v836_v53, %s2051_s23  ;;  %854 = vrot.lane.b32.xlu1 %v836_v53, %s2057_s13 }
 0x3ca   : > { %876 = vperm.xlu0 %1973, %v1645_v54   ;;  %846 = vrot.lane.b32.xlu1 %v836_v53, %s2059_s15  ;;  %v1689_v54 = vld [vmem:[%s2522_s5 + $0x20] sm:$0xff] }
 0x3ce   : > { %838 = vrot.lane.b32.xlu1 %v836_v53, %s2054_s29 }
 0x430   : > { %v867_v55 = vpop.permute.xlu1 %866  ;;  %v859_v57 = vpop.permute.xlu0 %858 }
 0x431   : > { %1824 = vmatpush3.msk.msra.mxu0 %vm751_vm6, %v867_v55 }
 0x432   : > { %1825 = vmatprep.subr.mxu0 %v2049_v2 }
 0x434   : > { %v863_v58 = vpop.permute.xlu1 %862  ;;  %v851_v60 = vpop.permute.xlu0 %850 }
 0x435   : > { %1826 = vmatpush3.msk.msra.mxu0 %vm746_vm7, %v863_v58 }
 0x436   : > { %1827 = vmatprep.subr.mxu0 %v2049_v2 }
 0x437   : > { %1828 = vmatpush3.msk.msra.mxu0 %vm741_vm8, %v859_v57 }
 0x438   : > { %1829 = vmatprep.subr.mxu0 %v2049_v2  ;;  %v855_v59 = vpop.permute.xlu1 %854  ;;  %v843_v62 = vpop.permute.xlu0 %842 }
 0x439   : > { %1830 = vmatpush3.msk.msra.mxu0 %vm736_vm9, %v855_v59 }
 0x43a   : > { %1831 = vmatprep.subr.mxu0 %v2049_v2 }
 0x43b   : > { %1832 = vmatpush3.msra.mxu0 %v836_v53 }
 0x43c   : > { %1833 = vmatprep.subr.mxu0 %v2049_v2  ;;  %v847_v61 = vpop.permute.xlu1 %846 }
 0x43d   : > { %1834 = vmatpush3.msk.msra.mxu0 %vm2240_vm11, %v851_v60 }
 0x43e   : > { %1835 = vmatprep.subr.mxu0 %v2049_v2 }
 0x43f   : > { %1836 = vmatpush3.msk.msra.mxu0 %vm2247_vm12, %v847_v61 }
 0x440   : > { %1837 = vmatprep.subr.mxu0 %v2049_v2  ;;  %v839_v1 = vpop.permute.xlu1 %838 }
 0x441   : > { %1838 = vmatpush3.msk.msra.mxu0 %vm2254_vm13, %v843_v62 }
 0x442   : > { %1839 = vmatprep.subr.mxu0 %v2049_v2 }
 0x443   : > { %1840 = vmatpush3.msk.msra.mxu0 %vm2262_vm14, %v839_v1  ;;  %v1452_v1 = vld [vmem:[#allocation4 + $0xf0] sm:$0xff] }
 0x444   : > { %1842 = vmatmul.mubr.msk.f32.vlgmr.msra.gmra.mxu0 %vm761_vm15, %v1644_v0  ;;  %1865 = vmatprep.subr.mxu0 %v2049_v2  ;;  %v1453_v0 = vld [vmem:[#allocation4 + $0xf8] sm:$0xff] }
 0x445   : > { %1883 = vmatprep.mubr.msk.f32.mxu0 %vm2050_vm1, %v2049_v2  ;;  %v877_v3 = vpop.permute.xlu0 %876 }
 0x504   : > { %v948_v4 = vpop.f32.mrf.mxu0 }
 0x505   : > { %v949_v5 = vadd.f32 %v948_v4, %v877_v3  ;;  %v1451_v3 = vld [vmem:[#allocation4 + $0xe8] sm:$0xff]  ;;  %v1705_v4 = vld [vmem:[%s2523_s6 + $0x30] sm:$0xff] }
 0x506   : > { %v1843_v6 = vpop.f32.mrf.mxu0 }
 0x507   : > { %v952_v7 = vmul.f32 %v2208_v29, %v949_v5  ;;  %v1450_v5 = vld [vmem:[#allocation4 + $0xe0] sm:$0xff]  ;;  %v1449_v6 = vld [vmem:[#allocation4 + $0xd8] sm:$0xff] }
 0x509   : > { %v2320_v8 = vadd.f32 %v952_v7, %v2211_v33  ;;  %v1448_v7 = vld [vmem:[#allocation4 + $0xd0] sm:$0xff] }
 0x50b   : > { %979 = vrot.lane.b32.xlu0 %v2320_v8, %s2055_s11  ;;  %983 = vrot.lane.b32.xlu1 %v2320_v8, %s2056_s12 }
 0x50f   : > { %971 = vrot.lane.b32.xlu0 %v2320_v8, %s2057_s13  ;;  %975 = vrot.lane.b32.xlu1 %v2320_v8, %s2058_s14 }
 0x513   : > { %963 = vrot.lane.b32.xlu0 %v2320_v8, %s2059_s15  ;;  %967 = vrot.lane.b32.xlu1 %v2320_v8, %s2053_s25 }
 0x517   : > { %955 = vrot.lane.b32.xlu0 %v2320_v8, %s2054_s29  ;;  %959 = vrot.lane.b32.xlu1 %v2320_v8, %s2051_s23 }
 0x51b   : > { %993 = vperm.xlu1 %1972, %v1660_v9   ;;  %v1446_v9 = vld [vmem:[#allocation4 + $0xc0] sm:$0xff] }
 0x57d   : > { %v980_v10 = vpop.permute.xlu0 %979  ;;  %v984_v11 = vpop.permute.xlu1 %983 }
 0x57e   : > { %1845 = vmatpush3.msk.msra.mxu1 %vm751_vm6, %v984_v11  ;;  %v1444_v11 = vld [vmem:[#allocation4 + $0xb0] sm:$0xff] }
 0x57f   : > { %1846 = vmatprep.subr.mxu1 %v2049_v2 }
 0x580   : > { %1847 = vmatpush3.msk.msra.mxu1 %vm746_vm7, %v980_v10  ;;  %v1445_v10 = vld [vmem:[#allocation4 + $0xb8] sm:$0xff] }
 0x581   : > { %v972_v12 = vpop.permute.xlu0 %971  ;;  %1848 = vmatprep.subr.mxu1 %v2049_v2  ;;  %v976_v13 = vpop.permute.xlu1 %975 }
 0x582   : > { %1849 = vmatpush3.msk.msra.mxu1 %vm741_vm8, %v976_v13  ;;  %v1442_v13 = vld [vmem:[#allocation4 + $0xa0] sm:$0xff] }
 0x583   : > { %1850 = vmatprep.subr.mxu1 %v2049_v2 }
 0x584   : > { %1851 = vmatpush3.msk.msra.mxu1 %vm736_vm9, %v972_v12  ;;  %v1443_v12 = vld [vmem:[#allocation4 + $0xa8] sm:$0xff] }
 0x585   : > { %1852 = vmatprep.subr.mxu1 %v2049_v2  ;;  %v968_v14 = vpop.permute.xlu1 %967  ;;  %v964_v15 = vpop.permute.xlu0 %963 }
 0x586   : > { %1853 = vmatpush3.msra.mxu1 %v2320_v8 }
 0x587   : > { %1854 = vmatprep.subr.mxu1 %v2049_v2 }
 0x588   : > { %1855 = vmatpush3.msk.msra.mxu1 %vm2240_vm11, %v968_v14  ;;  %v1441_v14 = vld [vmem:[#allocation4 + $0x98] sm:$0xff] }
 0x589   : > { %1856 = vmatprep.subr.mxu1 %v2049_v2  ;;  %v960_v16 = vpop.permute.xlu1 %959  ;;  %v956_v18 = vpop.permute.xlu0 %955 }
 0x58a   : > { %1857 = vmatpush3.msk.msra.mxu1 %vm2247_vm12, %v964_v15  ;;  %v1440_v15 = vld [vmem:[#allocation4 + $0x90] sm:$0xff] }
 0x58b   : > { %1858 = vmatprep.subr.mxu1 %v2049_v2 }
 0x58c   : > { %1859 = vmatpush3.msk.msra.mxu1 %vm2254_vm13, %v960_v16  ;;  %v1439_v16 = vld [vmem:[#allocation4 + $0x88] sm:$0xff] }
 0x58d   : > { %1860 = vmatprep.subr.mxu1 %v2049_v2 }
 0x58e   : > { %1861 = vmatpush3.msk.msra.mxu1 %vm2262_vm14, %v956_v18  ;;  %v1437_v18 = vld [vmem:[#allocation4 + $0x78] sm:$0xff] }
 0x58f   : > { %1863 = vmatmul.mubr.msk.f32.vlgmr.msra.gmra.mxu1 %vm761_vm15, %v1659_v17  ;;  %1886 = vmatprep.subr.mxu1 %v2049_v2  ;;  %v1438_v17 = vld [vmem:[#allocation4 + $0x80] sm:$0xff] }
 0x590   : > { %1904 = vmatprep.mubr.msk.f32.mxu1 %vm2050_vm1, %v2049_v2 }
 0x596   : > { %v994_v19 = vpop.permute.xlu1 %993 }
 0x64f   : > { %v1065_v20 = vpop.f32.mrf.mxu1 }
 0x650   : > { %v1066_v21 = vadd.f32 %v1065_v20, %v994_v19  ;;  %v1436_v19 = vld [vmem:[#allocation4 + $0x70] sm:$0xff]  ;;  %v1435_v20 = vld [vmem:[#allocation4 + $0x68] sm:$0xff] }
 0x651   : > { %v1864_v22 = vpop.f32.mrf.mxu1 }
 0x652   : > { %v1069_v23 = vmul.f32 %v2208_v29, %v1066_v21  ;;  %v1434_v21 = vld [vmem:[#allocation4 + $0x60] sm:$0xff]  ;;  %v1433_v22 = vld [vmem:[#allocation4 + $0x58] sm:$0xff] }
 0x654   : > { %v1070_v24 = vmax.f32 %v1069_v23, 0.0  ;;  %v1432_v23 = vld [vmem:[#allocation4 + $0x50] sm:$0xff] }
 0x656   : > { %1096 = vrot.lane.b32.xlu1 %v1070_v24, %s2055_s11  ;;  %1100 = vrot.lane.b32.xlu0 %v1070_v24, %s2056_s12 }
 0x65a   : > { %1088 = vrot.lane.b32.xlu1 %v1070_v24, %s2057_s13  ;;  %1092 = vrot.lane.b32.xlu0 %v1070_v24, %s2058_s14 }
 0x65e   : > { %1080 = vrot.lane.b32.xlu1 %v1070_v24, %s2059_s15  ;;  %1084 = vrot.lane.b32.xlu0 %v1070_v24, %s2053_s25 }
 0x662   : > { %1072 = vrot.lane.b32.xlu1 %v1070_v24, %s2054_s29  ;;  %1076 = vrot.lane.b32.xlu0 %v1070_v24, %s2051_s23 }
 0x666   : > { %1110 = vperm.xlu0 %1973, %v1675_v25   ;;  %v1430_v25 = vld [vmem:[#allocation4 + $0x40] sm:$0xff] }
 0x6c8   : > { %v1097_v26 = vpop.permute.xlu1 %1096  ;;  %v1101_v27 = vpop.permute.xlu0 %1100 }
 0x6c9   : > { %1866 = vmatpush3.msk.msra.mxu0 %vm751_vm6, %v1101_v27 }
 0x6ca   : > { %1867 = vmatprep.subr.mxu0 %v2049_v2 }
 0x6cb   : > { %1868 = vmatpush3.msk.msra.mxu0 %vm746_vm7, %v1097_v26  ;;  %v1429_v26 = vld [vmem:[#allocation4 + $0x38] sm:$0xff] }
 0x6cc   : > { %v1089_v28 = vpop.permute.xlu1 %1088  ;;  %1869 = vmatprep.subr.mxu0 %v2049_v2  ;;  %v1093_v30 = vpop.permute.xlu0 %1092 }
 0x6cd   : > { %1870 = vmatpush3.msk.msra.mxu0 %vm741_vm8, %v1093_v30 }
 0x6ce   : > { %1871 = vmatprep.subr.mxu0 %v2049_v2 }
 0x6cf   : > { %1872 = vmatpush3.msk.msra.mxu0 %vm736_vm9, %v1089_v28 }
 0x6d0   : > { %1873 = vmatprep.subr.mxu0 %v2049_v2  ;;  %v1085_v31 = vpop.permute.xlu0 %1084  ;;  %v1081_v32 = vpop.permute.xlu1 %1080 }
 0x6d1   : > { %1874 = vmatpush3.msra.mxu0 %v1070_v24  ;;  %v1431_v24 = vld [vmem:[#allocation4 + $0x48] sm:$0xff] }
 0x6d2   : > { %1875 = vmatprep.subr.mxu0 %v2049_v2 }
 0x6d3   : > { %1876 = vmatpush3.msk.msra.mxu0 %vm2240_vm11, %v1085_v31 }
 0x6d4   : > { %1877 = vmatprep.subr.mxu0 %v2049_v2  ;;  %v1077_v33 = vpop.permute.xlu0 %1076  ;;  %v1073_v35 = vpop.permute.xlu1 %1072 }
 0x6d5   : > { %1878 = vmatpush3.msk.msra.mxu0 %vm2247_vm12, %v1081_v32 }
 0x6d6   : > { %1879 = vmatprep.subr.mxu0 %v2049_v2 }
 0x6d7   : > { %1880 = vmatpush3.msk.msra.mxu0 %vm2254_vm13, %v1077_v33 }
 0x6d8   : > { %1881 = vmatprep.subr.mxu0 %v2049_v2 }
 0x6d9   : > { %1882 = vmatpush3.msk.msra.mxu0 %vm2262_vm14, %v1073_v35  ;;  %v1704_v35 = vld [vmem:[%s2522_s5 + $0x28] sm:$0xff] }
 0x6da   : > { %1884 = vmatmul.mubr.msk.f32.vlgmr.msra.gmra.mxu0 %vm761_vm15, %v1674_v34  ;;  %1907 = vmatprep.subr.mxu0 %v2049_v2 }
 0x6db   : > { %1925 = vmatprep.mubr.msk.f32.mxu0 %vm2050_vm1, %v2049_v2 }
 0x6e1   : > { %v1111_v36 = vpop.permute.xlu0 %1110 }
 0x79a   : > { %v1182_v37 = vpop.f32.mrf.mxu0 }
 0x79b   : > { %v1183_v38 = vadd.f32 %v1182_v37, %v1111_v36  ;;  %v1426_v37 = vld [vmem:[#allocation4 + $0x20] sm:$0xff] }
 0x79c   : > { %v1885_v40 = vpop.f32.mrf.mxu0 }
 0x79d   : > { %v1186_v41 = vmul.f32 %v2208_v29, %v1183_v38  ;;  %v1424_v38 = vld [vmem:[#allocation4 + $0x10] sm:$0xff]  ;;  %v1423_v40 = vld [vmem:[#allocation4 + $0x8] sm:$0xff] }
 0x79f   : > { %v2410_v45 = vadd.f32 %v1186_v41, %v2320_v8  ;;  %v1447_v8 = vld [vmem:[#allocation4 + $0xc8] sm:$0xff]  ;;  %v1422_v41 = vld [vmem:[#allocation4] sm:$0xff] }
 0x7a1   : > { %1213 = vrot.lane.b32.xlu0 %v2410_v45, %s2055_s11  ;;  %1217 = vrot.lane.b32.xlu1 %v2410_v45, %s2056_s12 }
 0x7a5   : > { %1205 = vrot.lane.b32.xlu0 %v2410_v45, %s2057_s13  ;;  %1209 = vrot.lane.b32.xlu1 %v2410_v45, %s2058_s14 }
 0x7a9   : > { %1197 = vrot.lane.b32.xlu0 %v2410_v45, %s2059_s15  ;;  %1201 = vrot.lane.b32.xlu1 %v2410_v45, %s2053_s25 }
 0x7ad   : > { %1189 = vrot.lane.b32.xlu0 %v2410_v45, %s2054_s29  ;;  %1193 = vrot.lane.b32.xlu1 %v2410_v45, %s2051_s23 }
 0x7b1   : > { %1227 = vperm.xlu1 %1972, %v1690_v46  }
 0x813   : > { %v1214_v47 = vpop.permute.xlu0 %1213  ;;  %v1218_v48 = vpop.permute.xlu1 %1217 }
 0x814   : > { %1887 = vmatpush3.msk.msra.mxu1 %vm751_vm6, %v1218_v48 }
 0x815   : > { %1888 = vmatprep.subr.mxu1 %v2049_v2 }
 0x816   : > { %1889 = vmatpush3.msk.msra.mxu1 %vm746_vm7, %v1214_v47 }
 0x817   : > { %v1206_v49 = vpop.permute.xlu0 %1205  ;;  %1890 = vmatprep.subr.mxu1 %v2049_v2  ;;  %v1210_v50 = vpop.permute.xlu1 %1209 }
 0x818   : > { %1891 = vmatpush3.msk.msra.mxu1 %vm741_vm8, %v1210_v50 }
 0x819   : > { %1892 = vmatprep.subr.mxu1 %v2049_v2 }
 0x81a   : > { %1893 = vmatpush3.msk.msra.mxu1 %vm736_vm9, %v1206_v49 }
 0x81b   : > { %1894 = vmatprep.subr.mxu1 %v2049_v2  ;;  %v1202_v51 = vpop.permute.xlu1 %1201  ;;  %v1198_v52 = vpop.permute.xlu0 %1197 }
 0x81c   : > { %1895 = vmatpush3.msra.mxu1 %v2410_v45 }
 0x81d   : > { %1896 = vmatprep.subr.mxu1 %v2049_v2 }
 0x81e   : > { %1897 = vmatpush3.msk.msra.mxu1 %vm2240_vm11, %v1202_v51 }
 0x81f   : > { %1898 = vmatprep.subr.mxu1 %v2049_v2  ;;  %v1194_v53 = vpop.permute.xlu1 %1193  ;;  %v1190_v55 = vpop.permute.xlu0 %1189 }
 0x820   : > { %1899 = vmatpush3.msk.msra.mxu1 %vm2247_vm12, %v1198_v52 }
 0x821   : > { %1900 = vmatprep.subr.mxu1 %v2049_v2 }
 0x822   : > { %1901 = vmatpush3.msk.msra.mxu1 %vm2254_vm13, %v1194_v53 }
 0x823   : > { %1902 = vmatprep.subr.mxu1 %v2049_v2 }
 0x824   : > { %1903 = vmatpush3.msk.msra.mxu1 %vm2262_vm14, %v1190_v55 }
 0x825   : > { %1905 = vmatmul.mubr.msk.f32.vlgmr.msra.gmra.mxu1 %vm761_vm15, %v1689_v54  ;;  %1454 = vmatprep.subr.mxu1 %v1453_v0 }
 0x826   : > { %1518 = vmatprep.mubr.f32.mxu1 %v2049_v2  ;;  %1455 = vmatpush1.msra.mxu1 %v1452_v1 }
 0x827   : > { %1456 = vmatprep.subr.mxu1 %v1451_v3 }
 0x828   : > { %1457 = vmatpush1.msra.mxu1 %v1450_v5 }
 0x829   : > { %1458 = vmatprep.subr.mxu1 %v1449_v6 }
 0x82a   : > { %1459 = vmatpush1.msra.mxu1 %v1448_v7 }
 0x82b   : > { %1460 = vmatprep.subr.mxu1 %v1447_v8 }
 0x82c   : > { %v1228_v57 = vpop.permute.xlu1 %1227  ;;  %1461 = vmatpush1.msra.mxu1 %v1446_v9 }
 0x82d   : > { %1462 = vmatprep.subr.mxu1 %v1445_v10 }
 0x82e   : > { %1463 = vmatpush1.msra.mxu1 %v1444_v11 }
 0x82f   : > { %1464 = vmatprep.subr.mxu1 %v1443_v12 }
 0x830   : > { %1465 = vmatpush1.msra.mxu1 %v1442_v13 }
 0x831   : > { %1466 = vmatprep.subr.mxu1 %v1441_v14 }
 0x832   : > { %1467 = vmatpush1.msra.mxu1 %v1440_v15 }
 0x833   : > { %1468 = vmatprep.subr.mxu1 %v1439_v16 }
 0x834   : > { %1469 = vmatpush1.msra.mxu1 %v1438_v17 }
 0x835   : > { %1470 = vmatprep.subr.mxu1 %v1437_v18 }
 0x836   : > { %1471 = vmatpush1.msra.mxu1 %v1436_v19 }
 0x837   : > { %1472 = vmatprep.subr.mxu1 %v1435_v20 }
 0x838   : > { %1473 = vmatpush1.msra.mxu1 %v1434_v21 }
 0x839   : > { %1474 = vmatprep.subr.mxu1 %v1433_v22 }
 0x83a   : > { %1475 = vmatpush1.msra.mxu1 %v1432_v23 }
 0x83b   : > { %1476 = vmatprep.subr.mxu1 %v1431_v24 }
 0x83c   : > { %1477 = vmatpush1.msra.mxu1 %v1430_v25 }
 0x83d   : > { %1478 = vmatprep.subr.mxu1 %v1429_v26 }
 0x83e   : > { %1479 = vmatpush1.msra.mxu1 %v1428_v39 }
 0x83f   : > { %1480 = vmatprep.subr.mxu1 %v1427_v42 }
 0x840   : > { %1481 = vmatpush1.msra.mxu1 %v1426_v37 }
 0x841   : > { %1482 = vmatprep.subr.mxu1 %v1425_v43 }
 0x842   : > { %1483 = vmatpush1.msra.mxu1 %v1424_v38 }
 0x843   : > { %1484 = vmatprep.subr.mxu1 %v1423_v40 }
 0x844   : > { %1485 = vmatpush1.msra.mxu1 %v1422_v41 }
 0x8e5   : > { %v1299_v58 = vpop.f32.mrf.mxu1 }
 0x8e6   : > { %v1300_v59 = vadd.f32 %v1299_v58, %v1228_v57 }
 0x8e7   : > { %v1906_v60 = vpop.f32.mrf.mxu1 }
 0x8e8   : > { %v1303_v61 = vmul.f32 %v2208_v29, %v1300_v59 }
 0x8ea   : > { %v2458_v62 = vmax.f32 %v1303_v61, 0.0 }
 0x8ec   : > { %1330 = vrot.lane.b32.xlu1 %v2458_v62, %s2055_s11  ;;  %1334 = vrot.lane.b32.xlu0 %v2458_v62, %s2056_s12 }
 0x8f0   : > { %1322 = vrot.lane.b32.xlu1 %v2458_v62, %s2057_s13  ;;  %1326 = vrot.lane.b32.xlu0 %v2458_v62, %s2058_s14 }
 0x8f4   : > { %1314 = vrot.lane.b32.xlu1 %v2458_v62, %s2059_s15  ;;  %1318 = vrot.lane.b32.xlu0 %v2458_v62, %s2053_s25 }
 0x8f8   : > { %1306 = vrot.lane.b32.xlu1 %v2458_v62, %s2054_s29  ;;  %1310 = vrot.lane.b32.xlu0 %v2458_v62, %s2051_s23  ;;  %s1722_s29 = sshll.u32 %s2536_s27, 5 }
 0x8f9   : > { %s308_s15 = scalar_lea.vmem %s2524_s7, %s1722_s29 }
 0x8fc   : > { %1344 = vperm.xlu0 %1973, %v1705_v4  }
 0x95e   : > { %v1331_v27 = vpop.permute.xlu1 %1330  ;;  %v1335_v28 = vpop.permute.xlu0 %1334 }
 0x95f   : > { %1908 = vmatpush3.msk.msra.mxu0 %vm751_vm6, %v1335_v28 }
 0x960   : > { %1909 = vmatprep.subr.mxu0 %v2049_v2 }
 0x961   : > { %1910 = vmatpush3.msk.msra.mxu0 %vm746_vm7, %v1331_v27 }
 0x962   : > { %v1323_v30 = vpop.permute.xlu1 %1322  ;;  %1911 = vmatprep.subr.mxu0 %v2049_v2  ;;  %v1327_v31 = vpop.permute.xlu0 %1326 }
 0x963   : > { %1912 = vmatpush3.msk.msra.mxu0 %vm741_vm8, %v1327_v31 }
 0x964   : > { %1913 = vmatprep.subr.mxu0 %v2049_v2 }
 0x965   : > { %1914 = vmatpush3.msk.msra.mxu0 %vm736_vm9, %v1323_v30 }
 0x966   : > { %1915 = vmatprep.subr.mxu0 %v2049_v2  ;;  %v1319_v32 = vpop.permute.xlu0 %1318  ;;  %v1315_v33 = vpop.permute.xlu1 %1314 }
 0x967   : > { %1916 = vmatpush3.msra.mxu0 %v2458_v62 }
 0x968   : > { %1917 = vmatprep.subr.mxu0 %v2049_v2 }
 0x969   : > { %1918 = vmatpush3.msk.msra.mxu0 %vm2240_vm11, %v1319_v32 }
 0x96a   : > { %1919 = vmatprep.subr.mxu0 %v2049_v2  ;;  %v1311_v34 = vpop.permute.xlu0 %1310  ;;  %v1307_v36 = vpop.permute.xlu1 %1306 }
 0x96b   : > { %1920 = vmatpush3.msk.msra.mxu0 %vm2247_vm12, %v1315_v33 }
 0x96c   : > { %1921 = vmatprep.subr.mxu0 %v2049_v2 }
 0x96d   : > { %1922 = vmatpush3.msk.msra.mxu0 %vm2254_vm13, %v1311_v34 }
 0x96e   : > { %1923 = vmatprep.subr.mxu0 %v2049_v2 }
 0x96f   : > { %1924 = vmatpush3.msk.msra.mxu0 %vm2262_vm14, %v1307_v36 }
 0x970   : > { %1926 = vmatmul.mubr.msk.f32.vlgmr.msra.gmra.mxu0 %vm761_vm15, %v1704_v35 }
 0x977   : > { %v1345_v2 = vpop.permute.xlu0 %1344 }
 0xa30   : > { %v1416_v44 = vpop.f32.mrf.mxu0 }
 0xa31   : > { %v1417_v46 = vadd.f32 %v1416_v44, %v1345_v2 }
 0xa32   : > { %v1927_v47 = vpop.f32.mrf.mxu0 }
 0xa33   : > { %v1420_v48 = vmul.f32 %v2208_v29, %v1417_v46 }
 0xa35   : > { %v1421_v49 = vadd.f32 %v1420_v48, %v2410_v45 }
 0xa37   : > { %1519 = vmatmul.mubr.f32.vlgmr.msra.gmra.mxu1 %v1421_v49 }
 0xaf7   : > { %v1520_v50 = vpop.f32.mrf.mxu1 }
 0xaf8   : > { %v1527_v51 = vrot.slane %v1520_v50, 4 }
 0xaf9   : > { %v1522_v52 = vpop.f32.mrf.mxu1 }
 0xafa   : > { %v1531_v53 = vsel %vm626_vm0, %v2161_v56, %v1527_v51  ;;  %1535 = vst [vmem:[%s308_s15 + $0x10] sm:$0xf] %v1527_v51  ;;  %v1528_v54 = vrot.slane %v1522_v52, 4 }
 0xafb   : > { %1533 = vst [vmem:[%s308_s15] sm:$0xff] %v1531_v53 }
 0xafc   : > { %v1532_v29 = vsel %vm626_vm0, %v2165_v63, %v1528_v54  ;;  %1536 = vst [vmem:[%s308_s15 + $0x18] sm:$0xf] %v1528_v54 }
 0xafd   : > { %1534 = vst [vmem:[%s308_s15 + $0x8] sm:$0xff] %v1532_v29 }
 0xafe PF: > { %s19_s24 = sadd.s32 1, %s2041_s24  }
 0xaff   : > { %p16_p3 = scmp.ge.s32.totalorder %s19_s24, 4  }
 0xb01   :  { %18 = sbr.rel (!%p16_p3) target bundleno = 2 (0x2), region = 98 }
 0xb06   :  { %1558 = vsyncpa [#allocation3], 1 }
 0xb07   :  { %1560 = vsyncpa [#allocation3 + $0x1], 1 }
 0xb08   :  { %1561 = vsyncpa [#allocation5], 1 }

</bundles_post_ra>
